<compile_context>
chip_gen: v7x
topology: tpu7x:2x2x1
jax: 0.10.0
libtpu: 0.0.40
codegen_flags: <defaults>
</compile_context>

<pallas_src>
import numpy as np
import jax
import jax.numpy as jnp
from jax.experimental import pallas as pl
from jax.experimental.pallas import tpu as pltpu  # noqa: F401  (TPU backend)

# ----------------------------------------------------------------------------
# Hyperparameters (mirror LSTNetBase.__init__)
# ----------------------------------------------------------------------------
NUM_SERIES = 4
CHANNELS = 6                      # channels % skip_size == 0
KERNEL_SIZE = 3
RNN_NUM_CELLS = 8
SKIP_RNN_NUM_CELLS = 5
SKIP_SIZE = 2
AR_WINDOW = 4
CONTEXT_LENGTH = 16
HORIZON = 1                       # prediction_length = None
OUTPUT_ACTIVATION = None
BATCH = 2
MINIMUM_SCALE = 1e-10

CONV_OUT = CONTEXT_LENGTH - KERNEL_SIZE            # 13 (as written in the torch code)
CONV_SKIP = CONV_OUT // SKIP_SIZE                  # 6
T_CONV = CONTEXT_LENGTH - KERNEL_SIZE + 1          # 14 (actual Conv2d output width)
FC_IN = RNN_NUM_CELLS + SKIP_SIZE * SKIP_RNN_NUM_CELLS   # 18

assert CHANNELS % SKIP_SIZE == 0
assert CONV_SKIP > 0
assert AR_WINDOW > 0

# fused-recurrence geometry
COMB_H = RNN_NUM_CELLS + SKIP_SIZE * SKIP_RNN_NUM_CELLS  # 18  (== FC_IN)
COMB3 = 3 * COMB_H                                       # 54  (r|z|n gate-major)
STEP_STRIDE = 64                                         # padded per-step gi width
GI_COLS = T_CONV * STEP_STRIDE                           # 896
assert COMB_H == FC_IN and STEP_STRIDE >= COMB3

WT_COLS = T_CONV * CHANNELS        # 84  (time-unrolled conv output width)
WTA_COLS = WT_COLS + NUM_SERIES    # 88  (conv + AR head fused in one matmul)

T0_SKIP = T_CONV - CONV_SKIP * SKIP_SIZE                 # 2
# main-GRU steps on which the (merged) skip-GRU also advances: 3,5,7,9,11,13
FUSED_STEPS = tuple(T0_SKIP + p * SKIP_SIZE + (SKIP_SIZE - 1) for p in range(CONV_SKIP))
FREEZE = 1.0e4   # z-gate bias offset -> sigmoid == 1.0 in f32 -> skip state frozen


# ----------------------------------------------------------------------------
# Packed-parameter layout: one (PACK_ROWS, PACK_COLS) f32 matrix, every tensor
# starts at an 8-aligned row so all in-kernel ref slices are tile-friendly.
# ----------------------------------------------------------------------------
def _align8(n):
    return ((n + 7) // 8) * 8


R_WT = 0                                                   # [WT | AR]          (64, 88)
R_GIH = _align8(NUM_SERIES * CONTEXT_LENGTH)               # 64  fused gi proj  (84, 896)
R_WHH = R_GIH + _align8(T_CONV * CHANNELS)                 # 152 fused W_hh^T   (18, 54)
R_FCW = R_WHH + _align8(COMB_H)                            # 176 fc W^T         (18, 4)
R_VEC = R_FCW + _align8(FC_IN)                             # 200 bias rows
VR_CB_AR = R_VEC + 0   # [tiled conv bias (84) | ar bias x NUM_SERIES]
VR_GIB = R_VEC + 1     # fused gi bias (896), incl. FREEZE offsets
VR_BHH = R_VEC + 2     # fused b_hh (54)
VR_FCB = R_VEC + 3     # fc bias (4)
PACK_ROWS = _align8(R_VEC + 4)                             # 208
PACK_COLS = GI_COLS                                        # 896 (multiple of 128)


def pack_params(raw):
    """Build the single packed parameter matrix (done ONCE, outside the forward)."""
    P = np.zeros((PACK_ROWS, PACK_COLS), np.float32)
    H, Hs = RNN_NUM_CELLS, SKIP_RNN_NUM_CELLS

    # --- conv, time-unrolled: WT[s*CL + (t+k), t*C + ch] = conv_w[ch, 0, s, k]
    cw = np.asarray(raw["conv_w"], np.float32)[:, 0]         # (C, S, K)
    for s in range(NUM_SERIES):
        for t in range(T_CONV):
            for k in range(KERNEL_SIZE):
                P[R_WT + s * CONTEXT_LENGTH + t + k,
                  t * CHANNELS:(t + 1) * CHANNELS] = cw[:, s, k]

    # --- AR head rides the same matmul: extra NUM_SERIES columns
    arw = np.asarray(raw["ar_w"], np.float32).reshape(-1)     # (AR_WINDOW,)
    for s in range(NUM_SERIES):
        for a in range(AR_WINDOW):
            P[R_WT + s * CONTEXT_LENGTH + (CONTEXT_LENGTH - AR_WINDOW) + a,
              WT_COLS + s] = arw[a]
    P[VR_CB_AR, 0:WT_COLS] = np.tile(np.asarray(raw["conv_b"], np.float32), T_CONV)
    P[VR_CB_AR, WT_COLS:WTA_COLS] = np.asarray(raw["ar_b"], np.float32)[0]

    # --- fused (main + merged-skip) input-hidden projection, per-step 54-wide
    #     gate-major blocks [r_main r_j0 r_j1 | z_main z_j0 z_j1 | n_main n_j0 n_j1]
    wih_t = np.asarray(raw["rnn_wih"], np.float32).T          # (C, 3H)  cols [r z n]
    swih_t = np.asarray(raw["skip_wih"], np.float32).T        # (C, 3Hs)
    bih = np.asarray(raw["rnn_bih"], np.float32)
    sbih = np.asarray(raw["skip_bih"], np.float32)
    fused = frozenset(FUSED_STEPS)
    for t in range(T_CONV):
        base = t * STEP_STRIDE
        rows_t = slice(R_GIH + t * CHANNELS, R_GIH + (t + 1) * CHANNELS)
        for g in range(3):                                    # 0:r 1:z 2:n
            c0 = base + g * COMB_H
            # main GRU gate g, fed by conv timestep t
            P[rows_t, c0:c0 + H] = wih_t[:, g * H:(g + 1) * H]
            P[VR_GIB, c0:c0 + H] = bih[g * H:(g + 1) * H]
            if t in fused:
                p = (t - T0_SKIP) // SKIP_SIZE
                for j in range(SKIP_SIZE):
                    tc = T0_SKIP + p * SKIP_SIZE + j          # conv step feeding chain j
                    rows_c = slice(R_GIH + tc * CHANNELS, R_GIH + (tc + 1) * CHANNELS)
                    cj = c0 + H + j * Hs
                    P[rows_c, cj:cj + Hs] = swih_t[:, g * Hs:(g + 1) * Hs]
                    P[VR_GIB, cj:cj + Hs] = sbih[g * Hs:(g + 1) * Hs]
            elif g == 1:
                # freeze skip state: z = sigmoid(FREEZE + bounded) == 1.0 -> h' = h
                P[VR_GIB, c0 + H:c0 + H + SKIP_SIZE * Hs] = FREEZE

    # --- fused block-diagonal W_hh^T (18, 54) + b_hh (54), same gate-major layout
    whh_t = np.asarray(raw["rnn_whh"], np.float32).T          # (H, 3H)
    swhh_t = np.asarray(raw["skip_whh"], np.float32).T        # (Hs, 3Hs)
    bhh = np.asarray(raw["rnn_bhh"], np.float32)
    sbhh = np.asarray(raw["skip_bhh"], np.float32)
    for g in range(3):
        c0 = g * COMB_H
        P[R_WHH:R_WHH + H, c0:c0 + H] = whh_t[:, g * H:(g + 1) * H]
        P[VR_BHH, c0:c0 + H] = bhh[g * H:(g + 1) * H]
        for j in range(SKIP_SIZE):
            r0 = R_WHH + H + j * Hs
            cj = c0 + H + j * Hs
            P[r0:r0 + Hs, cj:cj + Hs] = swhh_t[:, g * Hs:(g + 1) * Hs]
            P[VR_BHH, cj:cj + Hs] = sbhh[g * Hs:(g + 1) * Hs]

    # --- fc: input ordering [h_main(8), h_skip_j0(5), h_skip_j1(5)] == combined state
    P[R_FCW:R_FCW + FC_IN, 0:NUM_SERIES] = np.asarray(raw["fc_w"], np.float32).T
    P[VR_FCB, 0:NUM_SERIES] = np.asarray(raw["fc_b"], np.float32)
    return jnp.asarray(P)


# ----------------------------------------------------------------------------
# Pallas kernel (whole problem is VMEM-resident; gridless single call)
# ----------------------------------------------------------------------------
def lstnet_kernel(x_ref, obs_ref, p_ref, out_ref):
    x = x_ref[...]                                             # (B, S, CL) pre-windowed
    obs = obs_ref[...]                                         # (B, S, CL)

    # ---------------------------------- MeanScaler (keepdim, time_first=False)
    num_obs = jnp.sum(obs, axis=2, keepdims=True)                          # (B,S,1)
    sum_obs = jnp.sum(jnp.abs(x) * obs, axis=2, keepdims=True)             # (B,S,1)
    total_obs = jnp.sum(num_obs, axis=0, keepdims=True)                    # (1,S,1)
    default_scale = (jnp.sum(sum_obs, axis=0, keepdims=True)
                     / jnp.maximum(total_obs, 1.0))                        # (1,S,1)
    scale = sum_obs / jnp.maximum(num_obs, 1.0)
    scale = jnp.where(sum_obs > 0.0, scale, default_scale)                 # pts gate
    scale = jnp.maximum(scale, MINIMUM_SCALE)                              # (B,S,1)
    scaled = x / scale                                                     # (B,S,CL)

    # ------------------- conv (all taps) + AR head, fused into ONE matmul
    x_flat = jnp.concatenate([scaled[:, s, :] for s in range(NUM_SERIES)], axis=1)
    wta = p_ref[R_WT:R_WT + NUM_SERIES * CONTEXT_LENGTH, 0:WTA_COLS]       # (64, 88)
    cb_ar = p_ref[VR_CB_AR:VR_CB_AR + 1, 0:WTA_COLS]                       # (1, 88)
    combined = jnp.dot(x_flat, wta, preferred_element_type=jnp.float32) + cb_ar
    c_flat = jnp.maximum(combined[:, 0:WT_COLS], 0.0)                      # relu(conv)
    ar2d = combined[:, WT_COLS:WTA_COLS]                                   # (B, S)

    # ------------- hoisted input-hidden projection for the FUSED recurrence
    gih = p_ref[R_GIH:R_GIH + T_CONV * CHANNELS, 0:GI_COLS]                # (84, 896)
    gib = p_ref[VR_GIB:VR_GIB + 1, 0:GI_COLS]                              # (1, 896)
    gi_all = jnp.dot(c_flat, gih, preferred_element_type=jnp.float32) + gib

    # ------------- 14-step fused (main GRU + merged skip-GRU) recurrence
    whh = p_ref[R_WHH:R_WHH + COMB_H, 0:COMB3]                             # (18, 54)
    bhh = p_ref[VR_BHH:VR_BHH + 1, 0:COMB3]                                # (1, 54)
    h = jnp.zeros((BATCH, COMB_H), jnp.float32)
    for t in range(T_CONV):
        gh = jnp.dot(h, whh, preferred_element_type=jnp.float32) + bhh
        gi = gi_all[:, t * STEP_STRIDE:t * STEP_STRIDE + COMB3]
        r = jax.nn.sigmoid(gi[:, 0:COMB_H] + gh[:, 0:COMB_H])
        z = jax.nn.sigmoid(gi[:, COMB_H:2 * COMB_H] + gh[:, COMB_H:2 * COMB_H])
        n = jnp.tanh(gi[:, 2 * COMB_H:COMB3] + r * gh[:, 2 * COMB_H:COMB3])
        h = (1.0 - z) * n + z * h

    # ------------- fc([h_main, skip_j0, skip_j1]) + AR head  (state already ordered)
    fcw = p_ref[R_FCW:R_FCW + FC_IN, 0:NUM_SERIES]                         # (18, 4)
    fcb = p_ref[VR_FCB:VR_FCB + 1, 0:NUM_SERIES]                           # (1, 4)
    res = jnp.dot(h, fcw, preferred_element_type=jnp.float32) + fcb        # (B, S)

    out2d = res + ar2d
    if OUTPUT_ACTIVATION == "sigmoid":
        out2d = jax.nn.sigmoid(out2d)
    elif OUTPUT_ACTIVATION == "tanh":
        out2d = jnp.tanh(out2d)

    # single lane-contiguous output slab: [out (S) | scale (S)]
    out_ref[...] = jnp.concatenate([out2d, scale[:, :, 0]], axis=1)


# ----------------------------------------------------------------------------
# Forward wrapper: window slice + one pallas_call + split/unsqueeze.
# ----------------------------------------------------------------------------
@jax.jit
def lstnet_forward(past_target, past_observed_values, packed_params):
    x = past_target[..., -CONTEXT_LENGTH:].astype(jnp.float32)
    obs = past_observed_values[..., -CONTEXT_LENGTH:].astype(jnp.float32)
    slab = pl.pallas_call(
        lstnet_kernel,
        out_shape=jax.ShapeDtypeStruct((BATCH, 2 * NUM_SERIES), jnp.float32),
    )(x, obs, packed_params)
    out = slab[:, 0:NUM_SERIES][..., None]                                 # (B, S, 1)
    scale = slab[:, NUM_SERIES:2 * NUM_SERIES][..., None]                  # (B, S, 1)
    return out, scale


# ----------------------------------------------------------------------------
# Pure-JAX reference (mirrors the torch module op-for-op, raw param layout)
# ----------------------------------------------------------------------------
def _gru_step_torch(xx, hh, wih, whh, bih, bhh, hidden):
    gi = xx @ wih.T + bih
    gh = hh @ whh.T + bhh
    r = jax.nn.sigmoid(gi[:, :hidden] + gh[:, :hidden])
    z = jax.nn.sigmoid(gi[:, hidden:2 * hidden] + gh[:, hidden:2 * hidden])
    n = jnp.tanh(gi[:, 2 * hidden:] + r * gh[:, 2 * hidden:])
    return (1.0 - z) * n + z * hh


@jax.jit
def lstnet_reference(past_target, past_observed_values, raw):
    x = past_target[..., -CONTEXT_LENGTH:].astype(jnp.float32)
    obs = past_observed_values[..., -CONTEXT_LENGTH:].astype(jnp.float32)
    # MeanScaler
    num_obs = obs.sum(axis=2)
    sum_obs = (jnp.abs(x) * obs).sum(axis=2)
    total = num_obs.sum(axis=0)
    default_scale = sum_obs.sum(axis=0) / jnp.maximum(total, 1.0)
    scale = sum_obs / jnp.maximum(num_obs, 1.0)
    scale = jnp.where(sum_obs > 0.0, scale, default_scale[None, :])
    scale = jnp.maximum(scale, MINIMUM_SCALE)[:, :, None]                   # (B,S,1)
    scaled = x / scale                                                      # (B,S,CL)
    # Conv2d(1 -> C, kernel=(S, K)) + ReLU, output layout (B, C, T_CONV)
    cw = raw["conv_w"][:, 0]                                                # (C,S,K)
    c = jnp.zeros((BATCH, CHANNELS, T_CONV), jnp.float32)
    for k in range(KERNEL_SIZE):
        c = c + jnp.einsum("bst,cs->bct", scaled[:, :, k:k + T_CONV], cw[:, :, k])
    c = jnp.maximum(c + raw["conv_b"].reshape(1, CHANNELS, 1), 0.0)
    # main GRU (keep only final hidden state)
    h = jnp.zeros((BATCH, RNN_NUM_CELLS), jnp.float32)
    for t in range(T_CONV):
        h = _gru_step_torch(c[:, :, t], h, raw["rnn_wih"], raw["rnn_whh"],
                            raw["rnn_bih"], raw["rnn_bhh"], RNN_NUM_CELLS)
    # skip GRU
    t0 = T_CONV - CONV_SKIP * SKIP_SIZE
    hs = jnp.zeros((BATCH * SKIP_SIZE, SKIP_RNN_NUM_CELLS), jnp.float32)
    for p in range(CONV_SKIP):
        xp = c[:, :, t0 + p * SKIP_SIZE:t0 + (p + 1) * SKIP_SIZE]           # (B,C,SKIP)
        xp = jnp.transpose(xp, (0, 2, 1)).reshape(BATCH * SKIP_SIZE, CHANNELS)
        hs = _gru_step_torch(xp, hs, raw["skip_wih"], raw["skip_whh"],
                             raw["skip_bih"], raw["skip_bhh"], SKIP_RNN_NUM_CELLS)
    skip_feat = hs.reshape(BATCH, SKIP_SIZE * SKIP_RNN_NUM_CELLS)
    feat = jnp.concatenate([h, skip_feat], axis=1)
    res = feat @ raw["fc_w"].T + raw["fc_b"]
    # AR head
    ar_x = scaled[:, :, CONTEXT_LENGTH - AR_WINDOW:].reshape(BATCH * NUM_SERIES, AR_WINDOW)
    ar = (ar_x @ raw["ar_w"].T + raw["ar_b"]).reshape(BATCH, NUM_SERIES)
    out = res + ar
    if OUTPUT_ACTIVATION == "sigmoid":
        out = jax.nn.sigmoid(out)
    elif OUTPUT_ACTIVATION == "tanh":
        out = jnp.tanh(out)
    return out[..., None], scale


# ----------------------------------------------------------------------------
# Parameters (deterministic init; raw shapes follow the torch module)
# ----------------------------------------------------------------------------
def init_raw_params(key):
    ks = jax.random.split(key, 14)
    w = lambda k, shape, s=0.1: s * jax.random.normal(k, shape, jnp.float32)
    return dict(
        conv_w=w(ks[0], (CHANNELS, 1, NUM_SERIES, KERNEL_SIZE)),
        conv_b=w(ks[1], (CHANNELS,)),
        rnn_wih=w(ks[2], (3 * RNN_NUM_CELLS, CHANNELS)),
        rnn_whh=w(ks[3], (3 * RNN_NUM_CELLS, RNN_NUM_CELLS)),
        rnn_bih=w(ks[4], (3 * RNN_NUM_CELLS,)),
        rnn_bhh=w(ks[5], (3 * RNN_NUM_CELLS,)),
        skip_wih=w(ks[6], (3 * SKIP_RNN_NUM_CELLS, CHANNELS)),
        skip_whh=w(ks[7], (3 * SKIP_RNN_NUM_CELLS, SKIP_RNN_NUM_CELLS)),
        skip_bih=w(ks[8], (3 * SKIP_RNN_NUM_CELLS,)),
        skip_bhh=w(ks[9], (3 * SKIP_RNN_NUM_CELLS,)),
        fc_w=w(ks[10], (NUM_SERIES, FC_IN)),
        fc_b=w(ks[11], (NUM_SERIES,)),
        ar_w=w(ks[12], (1, AR_WINDOW)),
        ar_b=w(ks[13], (1,)),
    )


# ----------------------------------------------------------------------------
if __name__ == "__main__":
    key = jax.random.PRNGKey(0)
    k_data, k_obs, k_params = jax.random.split(key, 3)

    T_TOTAL = 20  # > context_length to exercise the [..., -context_length:] window
    past_target = 1.0 + jax.random.normal(k_data, (BATCH, NUM_SERIES, T_TOTAL), jnp.float32)
    past_observed = (jax.random.uniform(k_obs, (BATCH, NUM_SERIES, T_TOTAL)) > 0.1
                     ).astype(jnp.float32)

    raw = init_raw_params(k_params)
    packed = pack_params(raw)          # one-time, outside the jitted forward

    out, scale = lstnet_forward(past_target, past_observed, packed)
    out = jax.block_until_ready(out)
    scale = jax.block_until_ready(scale)

    out_ref, scale_ref = lstnet_reference(past_target, past_observed, raw)
    out_ref = jax.block_until_ready(out_ref)
    scale_ref = jax.block_until_ready(scale_ref)

    assert out.shape == (BATCH, NUM_SERIES, 1)
    assert scale.shape == (BATCH, NUM_SERIES, 1)
    np.testing.assert_allclose(np.asarray(out), np.asarray(out_ref), rtol=2e-3, atol=2e-3)
    np.testing.assert_allclose(np.asarray(scale), np.asarray(scale_ref), rtol=1e-5, atol=1e-6)

    print("KERNEL_OK")
</pallas_src>

<mosaic_0001>
module attributes {stable_mosaic.version = 11 : i64} {
  func.func @lstnet_kernel(%arg0: memref<2x4x16xf32, #tpu.memory_space<vmem>>, %arg1: memref<2x4x16xf32, #tpu.memory_space<vmem>>, %arg2: memref<208x896xf32, #tpu.memory_space<vmem>>, %arg3: memref<2x8xf32, #tpu.memory_space<vmem>>) attributes {dimension_semantics = [], scalar_prefetch = 0 : i64, scratch_operands = 0 : i64, tpu.core_type = #tpu.core_type<tc>} {
    %c0 = arith.constant 0 : index
    %c0_0 = arith.constant 0 : index
    %c0_1 = arith.constant 0 : index
    %0 = vector.load %arg0[%c0, %c0_0, %c0_1] : memref<2x4x16xf32, #tpu.memory_space<vmem>>, vector<2x4x16xf32>
    %c0_2 = arith.constant 0 : index
    %c0_3 = arith.constant 0 : index
    %c0_4 = arith.constant 0 : index
    %1 = vector.load %arg1[%c0_2, %c0_3, %c0_4] : memref<2x4x16xf32, #tpu.memory_space<vmem>>, vector<2x4x16xf32>
    %cst = arith.constant dense<0.000000e+00> : vector<2x4xf32>
    %2 = vector.multi_reduction <add>, %1, %cst [2] : vector<2x4x16xf32> to vector<2x4xf32>
    %3 = vector.shape_cast %2 : vector<2x4xf32> to vector<2x4x1xf32>
    %4 = math.absf %0 : vector<2x4x16xf32>
    %5 = arith.mulf %4, %1 : vector<2x4x16xf32>
    %cst_5 = arith.constant dense<0.000000e+00> : vector<2x4xf32>
    %6 = vector.multi_reduction <add>, %5, %cst_5 [2] : vector<2x4x16xf32> to vector<2x4xf32>
    %7 = vector.shape_cast %6 : vector<2x4xf32> to vector<2x4x1xf32>
    %cst_6 = arith.constant dense<0.000000e+00> : vector<4x1xf32>
    %8 = vector.multi_reduction <add>, %3, %cst_6 [0] : vector<2x4x1xf32> to vector<4x1xf32>
    %9 = vector.shape_cast %8 : vector<4x1xf32> to vector<1x4x1xf32>
    %cst_7 = arith.constant dense<0.000000e+00> : vector<4x1xf32>
    %10 = vector.multi_reduction <add>, %7, %cst_7 [0] : vector<2x4x1xf32> to vector<4x1xf32>
    %11 = vector.shape_cast %10 : vector<4x1xf32> to vector<1x4x1xf32>
    %cst_8 = arith.constant 1.000000e+00 : f32
    %12 = vector.broadcast %cst_8 : f32 to vector<1x4x1xf32>
    %13 = arith.maximumf %9, %12 : vector<1x4x1xf32>
    %14 = arith.divf %11, %13 : vector<1x4x1xf32>
    %cst_9 = arith.constant 1.000000e+00 : f32
    %15 = vector.broadcast %cst_9 : f32 to vector<2x4x1xf32>
    %16 = arith.maximumf %3, %15 : vector<2x4x1xf32>
    %17 = arith.divf %7, %16 : vector<2x4x1xf32>
    %cst_10 = arith.constant 0.000000e+00 : f32
    %18 = vector.broadcast %cst_10 : f32 to vector<2x4x1xf32>
    %19 = arith.cmpf ogt, %7, %18 : vector<2x4x1xf32>
    %20 = vector.shape_cast %14 : vector<1x4x1xf32> to vector<1x4x1xf32>
    %21 = vector.broadcast %20 : vector<1x4x1xf32> to vector<2x4x1xf32>
    %22 = arith.select %19, %17, %21 : vector<2x4x1xi1>, vector<2x4x1xf32>
    %cst_11 = arith.constant 1.000000e-10 : f32
    %23 = vector.broadcast %cst_11 : f32 to vector<2x4x1xf32>
    %24 = arith.maximumf %22, %23 : vector<2x4x1xf32>
    %25 = vector.broadcast %24 : vector<2x4x1xf32> to vector<2x4x16xf32>
    %26 = arith.divf %0, %25 : vector<2x4x16xf32>
    %27 = vector.extract_strided_slice %26 {offsets = [0, 0, 0], sizes = [2, 1, 16], strides = [1, 1, 1]} : vector<2x4x16xf32> to vector<2x1x16xf32>
    %28 = vector.shape_cast %27 : vector<2x1x16xf32> to vector<2x16xf32>
    %29 = vector.extract_strided_slice %26 {offsets = [0, 1, 0], sizes = [2, 1, 16], strides = [1, 1, 1]} : vector<2x4x16xf32> to vector<2x1x16xf32>
    %30 = vector.shape_cast %29 : vector<2x1x16xf32> to vector<2x16xf32>
    %31 = vector.extract_strided_slice %26 {offsets = [0, 2, 0], sizes = [2, 1, 16], strides = [1, 1, 1]} : vector<2x4x16xf32> to vector<2x1x16xf32>
    %32 = vector.shape_cast %31 : vector<2x1x16xf32> to vector<2x16xf32>
    %33 = vector.extract_strided_slice %26 {offsets = [0, 3, 0], sizes = [2, 1, 16], strides = [1, 1, 1]} : vector<2x4x16xf32> to vector<2x1x16xf32>
    %34 = vector.shape_cast %33 : vector<2x1x16xf32> to vector<2x16xf32>
    %35 = tpu.concatenate %28, %30, %32, %34 in 1 : vector<2x16xf32>, vector<2x16xf32>, vector<2x16xf32>, vector<2x16xf32> -> vector<2x64xf32>
    %c0_12 = arith.constant 0 : index
    %c0_13 = arith.constant 0 : index
    %36 = vector.load %arg2[%c0_12, %c0_13] : memref<208x896xf32, #tpu.memory_space<vmem>>, vector<64x88xf32>
    %c200 = arith.constant 200 : index
    %c0_14 = arith.constant 0 : index
    %37 = vector.load %arg2[%c200, %c0_14] : memref<208x896xf32, #tpu.memory_space<vmem>>, vector<1x88xf32>
    %cst_15 = arith.constant dense<0.000000e+00> : vector<2x88xf32>
    %38 = tpu.matmul %35, %36, %cst_15 {dimension_numbers = #tpu.dot_dimension_numbers<[1], [0], [0], [1], [0, 0, 1, 1], [], []>} : vector<2x64xf32>, vector<64x88xf32>, vector<2x88xf32> -> vector<2x88xf32>
    %39 = vector.broadcast %37 : vector<1x88xf32> to vector<2x88xf32>
    %40 = arith.addf %38, %39 : vector<2x88xf32>
    %41 = vector.extract_strided_slice %40 {offsets = [0, 0], sizes = [2, 84], strides = [1, 1]} : vector<2x88xf32> to vector<2x84xf32>
    %cst_16 = arith.constant 0.000000e+00 : f32
    %42 = vector.broadcast %cst_16 : f32 to vector<2x84xf32>
    %43 = arith.maximumf %41, %42 : vector<2x84xf32>
    %44 = vector.extract_strided_slice %40 {offsets = [0, 84], sizes = [2, 4], strides = [1, 1]} : vector<2x88xf32> to vector<2x4xf32>
    %c64 = arith.constant 64 : index
    %c0_17 = arith.constant 0 : index
    %45 = vector.load %arg2[%c64, %c0_17] : memref<208x896xf32, #tpu.memory_space<vmem>>, vector<84x896xf32>
    %c201 = arith.constant 201 : index
    %c0_18 = arith.constant 0 : index
    %46 = vector.load %arg2[%c201, %c0_18] : memref<208x896xf32, #tpu.memory_space<vmem>>, vector<1x896xf32>
    %cst_19 = arith.constant dense<0.000000e+00> : vector<2x896xf32>
    %47 = tpu.matmul %43, %45, %cst_19 {dimension_numbers = #tpu.dot_dimension_numbers<[1], [0], [0], [1], [0, 0, 1, 1], [], []>} : vector<2x84xf32>, vector<84x896xf32>, vector<2x896xf32> -> vector<2x896xf32>
    %48 = vector.broadcast %46 : vector<1x896xf32> to vector<2x896xf32>
    %49 = arith.addf %47, %48 : vector<2x896xf32>
    %c152 = arith.constant 152 : index
    %c0_20 = arith.constant 0 : index
    %50 = vector.load %arg2[%c152, %c0_20] : memref<208x896xf32, #tpu.memory_space<vmem>>, vector<18x54xf32>
    %c202 = arith.constant 202 : index
    %c0_21 = arith.constant 0 : index
    %51 = vector.load %arg2[%c202, %c0_21] : memref<208x896xf32, #tpu.memory_space<vmem>>, vector<1x54xf32>
    %cst_22 = arith.constant 0.000000e+00 : f32
    %52 = vector.broadcast %cst_22 : f32 to vector<2x18xf32>
    %cst_23 = arith.constant dense<0.000000e+00> : vector<2x54xf32>
    %53 = tpu.matmul %52, %50, %cst_23 {dimension_numbers = #tpu.dot_dimension_numbers<[1], [0], [0], [1], [0, 0, 1, 1], [], []>} : vector<2x18xf32>, vector<18x54xf32>, vector<2x54xf32> -> vector<2x54xf32>
    %54 = vector.broadcast %51 : vector<1x54xf32> to vector<2x54xf32>
    %55 = arith.addf %53, %54 : vector<2x54xf32>
    %56 = vector.extract_strided_slice %49 {offsets = [0, 0], sizes = [2, 54], strides = [1, 1]} : vector<2x896xf32> to vector<2x54xf32>
    %57 = vector.extract_strided_slice %56 {offsets = [0, 0], sizes = [2, 18], strides = [1, 1]} : vector<2x54xf32> to vector<2x18xf32>
    %58 = vector.extract_strided_slice %55 {offsets = [0, 0], sizes = [2, 18], strides = [1, 1]} : vector<2x54xf32> to vector<2x18xf32>
    %59 = arith.addf %57, %58 : vector<2x18xf32>
    %60 = arith.negf %59 : vector<2x18xf32>
    %61 = math.exp %60 : vector<2x18xf32>
    %cst_24 = arith.constant 1.000000e+00 : f32
    %62 = vector.broadcast %cst_24 : f32 to vector<2x18xf32>
    %63 = arith.addf %62, %61 : vector<2x18xf32>
    %64 = arith.divf %62, %63 : vector<2x18xf32>
    %65 = vector.extract_strided_slice %56 {offsets = [0, 18], sizes = [2, 18], strides = [1, 1]} : vector<2x54xf32> to vector<2x18xf32>
    %66 = vector.extract_strided_slice %55 {offsets = [0, 18], sizes = [2, 18], strides = [1, 1]} : vector<2x54xf32> to vector<2x18xf32>
    %67 = arith.addf %65, %66 : vector<2x18xf32>
    %68 = arith.negf %67 : vector<2x18xf32>
    %69 = math.exp %68 : vector<2x18xf32>
    %cst_25 = arith.constant 1.000000e+00 : f32
    %70 = vector.broadcast %cst_25 : f32 to vector<2x18xf32>
    %71 = arith.addf %70, %69 : vector<2x18xf32>
    %72 = arith.divf %70, %71 : vector<2x18xf32>
    %73 = vector.extract_strided_slice %56 {offsets = [0, 36], sizes = [2, 18], strides = [1, 1]} : vector<2x54xf32> to vector<2x18xf32>
    %74 = vector.extract_strided_slice %55 {offsets = [0, 36], sizes = [2, 18], strides = [1, 1]} : vector<2x54xf32> to vector<2x18xf32>
    %75 = arith.mulf %64, %74 : vector<2x18xf32>
    %76 = arith.addf %73, %75 : vector<2x18xf32>
    %77 = math.tanh %76 : vector<2x18xf32>
    %cst_26 = arith.constant 1.000000e+00 : f32
    %78 = vector.broadcast %cst_26 : f32 to vector<2x18xf32>
    %79 = arith.subf %78, %72 : vector<2x18xf32>
    %80 = arith.mulf %79, %77 : vector<2x18xf32>
    %81 = arith.mulf %72, %52 : vector<2x18xf32>
    %82 = arith.addf %80, %81 : vector<2x18xf32>
    %cst_27 = arith.constant dense<0.000000e+00> : vector<2x54xf32>
    %83 = tpu.matmul %82, %50, %cst_27 {dimension_numbers = #tpu.dot_dimension_numbers<[1], [0], [0], [1], [0, 0, 1, 1], [], []>} : vector<2x18xf32>, vector<18x54xf32>, vector<2x54xf32> -> vector<2x54xf32>
    %84 = vector.broadcast %51 : vector<1x54xf32> to vector<2x54xf32>
    %85 = arith.addf %83, %84 : vector<2x54xf32>
    %86 = vector.extract_strided_slice %49 {offsets = [0, 64], sizes = [2, 54], strides = [1, 1]} : vector<2x896xf32> to vector<2x54xf32>
    %87 = vector.extract_strided_slice %86 {offsets = [0, 0], sizes = [2, 18], strides = [1, 1]} : vector<2x54xf32> to vector<2x18xf32>
    %88 = vector.extract_strided_slice %85 {offsets = [0, 0], sizes = [2, 18], strides = [1, 1]} : vector<2x54xf32> to vector<2x18xf32>
    %89 = arith.addf %87, %88 : vector<2x18xf32>
    %90 = arith.negf %89 : vector<2x18xf32>
    %91 = math.exp %90 : vector<2x18xf32>
    %cst_28 = arith.constant 1.000000e+00 : f32
    %92 = vector.broadcast %cst_28 : f32 to vector<2x18xf32>
    %93 = arith.addf %92, %91 : vector<2x18xf32>
    %94 = arith.divf %92, %93 : vector<2x18xf32>
    %95 = vector.extract_strided_slice %86 {offsets = [0, 18], sizes = [2, 18], strides = [1, 1]} : vector<2x54xf32> to vector<2x18xf32>
    %96 = vector.extract_strided_slice %85 {offsets = [0, 18], sizes = [2, 18], strides = [1, 1]} : vector<2x54xf32> to vector<2x18xf32>
    %97 = arith.addf %95, %96 : vector<2x18xf32>
    %98 = arith.negf %97 : vector<2x18xf32>
    %99 = math.exp %98 : vector<2x18xf32>
    %cst_29 = arith.constant 1.000000e+00 : f32
    %100 = vector.broadcast %cst_29 : f32 to vector<2x18xf32>
    %101 = arith.addf %100, %99 : vector<2x18xf32>
    %102 = arith.divf %100, %101 : vector<2x18xf32>
    %103 = vector.extract_strided_slice %86 {offsets = [0, 36], sizes = [2, 18], strides = [1, 1]} : vector<2x54xf32> to vector<2x18xf32>
    %104 = vector.extract_strided_slice %85 {offsets = [0, 36], sizes = [2, 18], strides = [1, 1]} : vector<2x54xf32> to vector<2x18xf32>
    %105 = arith.mulf %94, %104 : vector<2x18xf32>
    %106 = arith.addf %103, %105 : vector<2x18xf32>
    %107 = math.tanh %106 : vector<2x18xf32>
    %cst_30 = arith.constant 1.000000e+00 : f32
    %108 = vector.broadcast %cst_30 : f32 to vector<2x18xf32>
    %109 = arith.subf %108, %102 : vector<2x18xf32>
    %110 = arith.mulf %109, %107 : vector<2x18xf32>
    %111 = arith.mulf %102, %82 : vector<2x18xf32>
    %112 = arith.addf %110, %111 : vector<2x18xf32>
    %cst_31 = arith.constant dense<0.000000e+00> : vector<2x54xf32>
    %113 = tpu.matmul %112, %50, %cst_31 {dimension_numbers = #tpu.dot_dimension_numbers<[1], [0], [0], [1], [0, 0, 1, 1], [], []>} : vector<2x18xf32>, vector<18x54xf32>, vector<2x54xf32> -> vector<2x54xf32>
    %114 = vector.broadcast %51 : vector<1x54xf32> to vector<2x54xf32>
    %115 = arith.addf %113, %114 : vector<2x54xf32>
    %116 = vector.extract_strided_slice %49 {offsets = [0, 128], sizes = [2, 54], strides = [1, 1]} : vector<2x896xf32> to vector<2x54xf32>
    %117 = vector.extract_strided_slice %116 {offsets = [0, 0], sizes = [2, 18], strides = [1, 1]} : vector<2x54xf32> to vector<2x18xf32>
    %118 = vector.extract_strided_slice %115 {offsets = [0, 0], sizes = [2, 18], strides = [1, 1]} : vector<2x54xf32> to vector<2x18xf32>
    %119 = arith.addf %117, %118 : vector<2x18xf32>
    %120 = arith.negf %119 : vector<2x18xf32>
    %121 = math.exp %120 : vector<2x18xf32>
    %cst_32 = arith.constant 1.000000e+00 : f32
    %122 = vector.broadcast %cst_32 : f32 to vector<2x18xf32>
    %123 = arith.addf %122, %121 : vector<2x18xf32>
    %124 = arith.divf %122, %123 : vector<2x18xf32>
    %125 = vector.extract_strided_slice %116 {offsets = [0, 18], sizes = [2, 18], strides = [1, 1]} : vector<2x54xf32> to vector<2x18xf32>
    %126 = vector.extract_strided_slice %115 {offsets = [0, 18], sizes = [2, 18], strides = [1, 1]} : vector<2x54xf32> to vector<2x18xf32>
    %127 = arith.addf %125, %126 : vector<2x18xf32>
    %128 = arith.negf %127 : vector<2x18xf32>
    %129 = math.exp %128 : vector<2x18xf32>
    %cst_33 = arith.constant 1.000000e+00 : f32
    %130 = vector.broadcast %cst_33 : f32 to vector<2x18xf32>
    %131 = arith.addf %130, %129 : vector<2x18xf32>
    %132 = arith.divf %130, %131 : vector<2x18xf32>
    %133 = vector.extract_strided_slice %116 {offsets = [0, 36], sizes = [2, 18], strides = [1, 1]} : vector<2x54xf32> to vector<2x18xf32>
    %134 = vector.extract_strided_slice %115 {offsets = [0, 36], sizes = [2, 18], strides = [1, 1]} : vector<2x54xf32> to vector<2x18xf32>
    %135 = arith.mulf %124, %134 : vector<2x18xf32>
    %136 = arith.addf %133, %135 : vector<2x18xf32>
    %137 = math.tanh %136 : vector<2x18xf32>
    %cst_34 = arith.constant 1.000000e+00 : f32
    %138 = vector.broadcast %cst_34 : f32 to vector<2x18xf32>
    %139 = arith.subf %138, %132 : vector<2x18xf32>
    %140 = arith.mulf %139, %137 : vector<2x18xf32>
    %141 = arith.mulf %132, %112 : vector<2x18xf32>
    %142 = arith.addf %140, %141 : vector<2x18xf32>
    %cst_35 = arith.constant dense<0.000000e+00> : vector<2x54xf32>
    %143 = tpu.matmul %142, %50, %cst_35 {dimension_numbers = #tpu.dot_dimension_numbers<[1], [0], [0], [1], [0, 0, 1, 1], [], []>} : vector<2x18xf32>, vector<18x54xf32>, vector<2x54xf32> -> vector<2x54xf32>
    %144 = vector.broadcast %51 : vector<1x54xf32> to vector<2x54xf32>
    %145 = arith.addf %143, %144 : vector<2x54xf32>
    %146 = vector.extract_strided_slice %49 {offsets = [0, 192], sizes = [2, 54], strides = [1, 1]} : vector<2x896xf32> to vector<2x54xf32>
    %147 = vector.extract_strided_slice %146 {offsets = [0, 0], sizes = [2, 18], strides = [1, 1]} : vector<2x54xf32> to vector<2x18xf32>
    %148 = vector.extract_strided_slice %145 {offsets = [0, 0], sizes = [2, 18], strides = [1, 1]} : vector<2x54xf32> to vector<2x18xf32>
    %149 = arith.addf %147, %148 : vector<2x18xf32>
    %150 = arith.negf %149 : vector<2x18xf32>
    %151 = math.exp %150 : vector<2x18xf32>
    %cst_36 = arith.constant 1.000000e+00 : f32
    %152 = vector.broadcast %cst_36 : f32 to vector<2x18xf32>
    %153 = arith.addf %152, %151 : vector<2x18xf32>
    %154 = arith.divf %152, %153 : vector<2x18xf32>
    %155 = vector.extract_strided_slice %146 {offsets = [0, 18], sizes = [2, 18], strides = [1, 1]} : vector<2x54xf32> to vector<2x18xf32>
    %156 = vector.extract_strided_slice %145 {offsets = [0, 18], sizes = [2, 18], strides = [1, 1]} : vector<2x54xf32> to vector<2x18xf32>
    %157 = arith.addf %155, %156 : vector<2x18xf32>
    %158 = arith.negf %157 : vector<2x18xf32>
    %159 = math.exp %158 : vector<2x18xf32>
    %cst_37 = arith.constant 1.000000e+00 : f32
    %160 = vector.broadcast %cst_37 : f32 to vector<2x18xf32>
    %161 = arith.addf %160, %159 : vector<2x18xf32>
    %162 = arith.divf %160, %161 : vector<2x18xf32>
    %163 = vector.extract_strided_slice %146 {offsets = [0, 36], sizes = [2, 18], strides = [1, 1]} : vector<2x54xf32> to vector<2x18xf32>
    %164 = vector.extract_strided_slice %145 {offsets = [0, 36], sizes = [2, 18], strides = [1, 1]} : vector<2x54xf32> to vector<2x18xf32>
    %165 = arith.mulf %154, %164 : vector<2x18xf32>
    %166 = arith.addf %163, %165 : vector<2x18xf32>
    %167 = math.tanh %166 : vector<2x18xf32>
    %cst_38 = arith.constant 1.000000e+00 : f32
    %168 = vector.broadcast %cst_38 : f32 to vector<2x18xf32>
    %169 = arith.subf %168, %162 : vector<2x18xf32>
    %170 = arith.mulf %169, %167 : vector<2x18xf32>
    %171 = arith.mulf %162, %142 : vector<2x18xf32>
    %172 = arith.addf %170, %171 : vector<2x18xf32>
    %cst_39 = arith.constant dense<0.000000e+00> : vector<2x54xf32>
    %173 = tpu.matmul %172, %50, %cst_39 {dimension_numbers = #tpu.dot_dimension_numbers<[1], [0], [0], [1], [0, 0, 1, 1], [], []>} : vector<2x18xf32>, vector<18x54xf32>, vector<2x54xf32> -> vector<2x54xf32>
    %174 = vector.broadcast %51 : vector<1x54xf32> to vector<2x54xf32>
    %175 = arith.addf %173, %174 : vector<2x54xf32>
    %176 = vector.extract_strided_slice %49 {offsets = [0, 256], sizes = [2, 54], strides = [1, 1]} : vector<2x896xf32> to vector<2x54xf32>
    %177 = vector.extract_strided_slice %176 {offsets = [0, 0], sizes = [2, 18], strides = [1, 1]} : vector<2x54xf32> to vector<2x18xf32>
    %178 = vector.extract_strided_slice %175 {offsets = [0, 0], sizes = [2, 18], strides = [1, 1]} : vector<2x54xf32> to vector<2x18xf32>
    %179 = arith.addf %177, %178 : vector<2x18xf32>
    %180 = arith.negf %179 : vector<2x18xf32>
    %181 = math.exp %180 : vector<2x18xf32>
    %cst_40 = arith.constant 1.000000e+00 : f32
    %182 = vector.broadcast %cst_40 : f32 to vector<2x18xf32>
    %183 = arith.addf %182, %181 : vector<2x18xf32>
    %184 = arith.divf %182, %183 : vector<2x18xf32>
    %185 = vector.extract_strided_slice %176 {offsets = [0, 18], sizes = [2, 18], strides = [1, 1]} : vector<2x54xf32> to vector<2x18xf32>
    %186 = vector.extract_strided_slice %175 {offsets = [0, 18], sizes = [2, 18], strides = [1, 1]} : vector<2x54xf32> to vector<2x18xf32>
    %187 = arith.addf %185, %186 : vector<2x18xf32>
    %188 = arith.negf %187 : vector<2x18xf32>
    %189 = math.exp %188 : vector<2x18xf32>
    %cst_41 = arith.constant 1.000000e+00 : f32
    %190 = vector.broadcast %cst_41 : f32 to vector<2x18xf32>
    %191 = arith.addf %190, %189 : vector<2x18xf32>
    %192 = arith.divf %190, %191 : vector<2x18xf32>
    %193 = vector.extract_strided_slice %176 {offsets = [0, 36], sizes = [2, 18], strides = [1, 1]} : vector<2x54xf32> to vector<2x18xf32>
    %194 = vector.extract_strided_slice %175 {offsets = [0, 36], sizes = [2, 18], strides = [1, 1]} : vector<2x54xf32> to vector<2x18xf32>
    %195 = arith.mulf %184, %194 : vector<2x18xf32>
    %196 = arith.addf %193, %195 : vector<2x18xf32>
    %197 = math.tanh %196 : vector<2x18xf32>
    %cst_42 = arith.constant 1.000000e+00 : f32
    %198 = vector.broadcast %cst_42 : f32 to vector<2x18xf32>
    %199 = arith.subf %198, %192 : vector<2x18xf32>
    %200 = arith.mulf %199, %197 : vector<2x18xf32>
    %201 = arith.mulf %192, %172 : vector<2x18xf32>
    %202 = arith.addf %200, %201 : vector<2x18xf32>
    %cst_43 = arith.constant dense<0.000000e+00> : vector<2x54xf32>
    %203 = tpu.matmul %202, %50, %cst_43 {dimension_numbers = #tpu.dot_dimension_numbers<[1], [0], [0], [1], [0, 0, 1, 1], [], []>} : vector<2x18xf32>, vector<18x54xf32>, vector<2x54xf32> -> vector<2x54xf32>
    %204 = vector.broadcast %51 : vector<1x54xf32> to vector<2x54xf32>
    %205 = arith.addf %203, %204 : vector<2x54xf32>
    %206 = vector.extract_strided_slice %49 {offsets = [0, 320], sizes = [2, 54], strides = [1, 1]} : vector<2x896xf32> to vector<2x54xf32>
    %207 = vector.extract_strided_slice %206 {offsets = [0, 0], sizes = [2, 18], strides = [1, 1]} : vector<2x54xf32> to vector<2x18xf32>
    %208 = vector.extract_strided_slice %205 {offsets = [0, 0], sizes = [2, 18], strides = [1, 1]} : vector<2x54xf32> to vector<2x18xf32>
    %209 = arith.addf %207, %208 : vector<2x18xf32>
    %210 = arith.negf %209 : vector<2x18xf32>
    %211 = math.exp %210 : vector<2x18xf32>
    %cst_44 = arith.constant 1.000000e+00 : f32
    %212 = vector.broadcast %cst_44 : f32 to vector<2x18xf32>
    %213 = arith.addf %212, %211 : vector<2x18xf32>
    %214 = arith.divf %212, %213 : vector<2x18xf32>
    %215 = vector.extract_strided_slice %206 {offsets = [0, 18], sizes = [2, 18], strides = [1, 1]} : vector<2x54xf32> to vector<2x18xf32>
    %216 = vector.extract_strided_slice %205 {offsets = [0, 18], sizes = [2, 18], strides = [1, 1]} : vector<2x54xf32> to vector<2x18xf32>
    %217 = arith.addf %215, %216 : vector<2x18xf32>
    %218 = arith.negf %217 : vector<2x18xf32>
    %219 = math.exp %218 : vector<2x18xf32>
    %cst_45 = arith.constant 1.000000e+00 : f32
    %220 = vector.broadcast %cst_45 : f32 to vector<2x18xf32>
    %221 = arith.addf %220, %219 : vector<2x18xf32>
    %222 = arith.divf %220, %221 : vector<2x18xf32>
    %223 = vector.extract_strided_slice %206 {offsets = [0, 36], sizes = [2, 18], strides = [1, 1]} : vector<2x54xf32> to vector<2x18xf32>
    %224 = vector.extract_strided_slice %205 {offsets = [0, 36], sizes = [2, 18], strides = [1, 1]} : vector<2x54xf32> to vector<2x18xf32>
    %225 = arith.mulf %214, %224 : vector<2x18xf32>
    %226 = arith.addf %223, %225 : vector<2x18xf32>
    %227 = math.tanh %226 : vector<2x18xf32>
    %cst_46 = arith.constant 1.000000e+00 : f32
    %228 = vector.broadcast %cst_46 : f32 to vector<2x18xf32>
    %229 = arith.subf %228, %222 : vector<2x18xf32>
    %230 = arith.mulf %229, %227 : vector<2x18xf32>
    %231 = arith.mulf %222, %202 : vector<2x18xf32>
    %232 = arith.addf %230, %231 : vector<2x18xf32>
    %cst_47 = arith.constant dense<0.000000e+00> : vector<2x54xf32>
    %233 = tpu.matmul %232, %50, %cst_47 {dimension_numbers = #tpu.dot_dimension_numbers<[1], [0], [0], [1], [0, 0, 1, 1], [], []>} : vector<2x18xf32>, vector<18x54xf32>, vector<2x54xf32> -> vector<2x54xf32>
    %234 = vector.broadcast %51 : vector<1x54xf32> to vector<2x54xf32>
    %235 = arith.addf %233, %234 : vector<2x54xf32>
    %236 = vector.extract_strided_slice %49 {offsets = [0, 384], sizes = [2, 54], strides = [1, 1]} : vector<2x896xf32> to vector<2x54xf32>
    %237 = vector.extract_strided_slice %236 {offsets = [0, 0], sizes = [2, 18], strides = [1, 1]} : vector<2x54xf32> to vector<2x18xf32>
    %238 = vector.extract_strided_slice %235 {offsets = [0, 0], sizes = [2, 18], strides = [1, 1]} : vector<2x54xf32> to vector<2x18xf32>
    %239 = arith.addf %237, %238 : vector<2x18xf32>
    %240 = arith.negf %239 : vector<2x18xf32>
    %241 = math.exp %240 : vector<2x18xf32>
    %cst_48 = arith.constant 1.000000e+00 : f32
    %242 = vector.broadcast %cst_48 : f32 to vector<2x18xf32>
    %243 = arith.addf %242, %241 : vector<2x18xf32>
    %244 = arith.divf %242, %243 : vector<2x18xf32>
    %245 = vector.extract_strided_slice %236 {offsets = [0, 18], sizes = [2, 18], strides = [1, 1]} : vector<2x54xf32> to vector<2x18xf32>
    %246 = vector.extract_strided_slice %235 {offsets = [0, 18], sizes = [2, 18], strides = [1, 1]} : vector<2x54xf32> to vector<2x18xf32>
    %247 = arith.addf %245, %246 : vector<2x18xf32>
    %248 = arith.negf %247 : vector<2x18xf32>
    %249 = math.exp %248 : vector<2x18xf32>
    %cst_49 = arith.constant 1.000000e+00 : f32
    %250 = vector.broadcast %cst_49 : f32 to vector<2x18xf32>
    %251 = arith.addf %250, %249 : vector<2x18xf32>
    %252 = arith.divf %250, %251 : vector<2x18xf32>
    %253 = vector.extract_strided_slice %236 {offsets = [0, 36], sizes = [2, 18], strides = [1, 1]} : vector<2x54xf32> to vector<2x18xf32>
    %254 = vector.extract_strided_slice %235 {offsets = [0, 36], sizes = [2, 18], strides = [1, 1]} : vector<2x54xf32> to vector<2x18xf32>
    %255 = arith.mulf %244, %254 : vector<2x18xf32>
    %256 = arith.addf %253, %255 : vector<2x18xf32>
    %257 = math.tanh %256 : vector<2x18xf32>
    %cst_50 = arith.constant 1.000000e+00 : f32
    %258 = vector.broadcast %cst_50 : f32 to vector<2x18xf32>
    %259 = arith.subf %258, %252 : vector<2x18xf32>
    %260 = arith.mulf %259, %257 : vector<2x18xf32>
    %261 = arith.mulf %252, %232 : vector<2x18xf32>
    %262 = arith.addf %260, %261 : vector<2x18xf32>
    %cst_51 = arith.constant dense<0.000000e+00> : vector<2x54xf32>
    %263 = tpu.matmul %262, %50, %cst_51 {dimension_numbers = #tpu.dot_dimension_numbers<[1], [0], [0], [1], [0, 0, 1, 1], [], []>} : vector<2x18xf32>, vector<18x54xf32>, vector<2x54xf32> -> vector<2x54xf32>
    %264 = vector.broadcast %51 : vector<1x54xf32> to vector<2x54xf32>
    %265 = arith.addf %263, %264 : vector<2x54xf32>
    %266 = vector.extract_strided_slice %49 {offsets = [0, 448], sizes = [2, 54], strides = [1, 1]} : vector<2x896xf32> to vector<2x54xf32>
    %267 = vector.extract_strided_slice %266 {offsets = [0, 0], sizes = [2, 18], strides = [1, 1]} : vector<2x54xf32> to vector<2x18xf32>
    %268 = vector.extract_strided_slice %265 {offsets = [0, 0], sizes = [2, 18], strides = [1, 1]} : vector<2x54xf32> to vector<2x18xf32>
    %269 = arith.addf %267, %268 : vector<2x18xf32>
    %270 = arith.negf %269 : vector<2x18xf32>
    %271 = math.exp %270 : vector<2x18xf32>
    %cst_52 = arith.constant 1.000000e+00 : f32
    %272 = vector.broadcast %cst_52 : f32 to vector<2x18xf32>
    %273 = arith.addf %272, %271 : vector<2x18xf32>
    %274 = arith.divf %272, %273 : vector<2x18xf32>
    %275 = vector.extract_strided_slice %266 {offsets = [0, 18], sizes = [2, 18], strides = [1, 1]} : vector<2x54xf32> to vector<2x18xf32>
    %276 = vector.extract_strided_slice %265 {offsets = [0, 18], sizes = [2, 18], strides = [1, 1]} : vector<2x54xf32> to vector<2x18xf32>
    %277 = arith.addf %275, %276 : vector<2x18xf32>
    %278 = arith.negf %277 : vector<2x18xf32>
    %279 = math.exp %278 : vector<2x18xf32>
    %cst_53 = arith.constant 1.000000e+00 : f32
    %280 = vector.broadcast %cst_53 : f32 to vector<2x18xf32>
    %281 = arith.addf %280, %279 : vector<2x18xf32>
    %282 = arith.divf %280, %281 : vector<2x18xf32>
    %283 = vector.extract_strided_slice %266 {offsets = [0, 36], sizes = [2, 18], strides = [1, 1]} : vector<2x54xf32> to vector<2x18xf32>
    %284 = vector.extract_strided_slice %265 {offsets = [0, 36], sizes = [2, 18], strides = [1, 1]} : vector<2x54xf32> to vector<2x18xf32>
    %285 = arith.mulf %274, %284 : vector<2x18xf32>
    %286 = arith.addf %283, %285 : vector<2x18xf32>
    %287 = math.tanh %286 : vector<2x18xf32>
    %cst_54 = arith.constant 1.000000e+00 : f32
    %288 = vector.broadcast %cst_54 : f32 to vector<2x18xf32>
    %289 = arith.subf %288, %282 : vector<2x18xf32>
    %290 = arith.mulf %289, %287 : vector<2x18xf32>
    %291 = arith.mulf %282, %262 : vector<2x18xf32>
    %292 = arith.addf %290, %291 : vector<2x18xf32>
    %cst_55 = arith.constant dense<0.000000e+00> : vector<2x54xf32>
    %293 = tpu.matmul %292, %50, %cst_55 {dimension_numbers = #tpu.dot_dimension_numbers<[1], [0], [0], [1], [0, 0, 1, 1], [], []>} : vector<2x18xf32>, vector<18x54xf32>, vector<2x54xf32> -> vector<2x54xf32>
    %294 = vector.broadcast %51 : vector<1x54xf32> to vector<2x54xf32>
    %295 = arith.addf %293, %294 : vector<2x54xf32>
    %296 = vector.extract_strided_slice %49 {offsets = [0, 512], sizes = [2, 54], strides = [1, 1]} : vector<2x896xf32> to vector<2x54xf32>
    %297 = vector.extract_strided_slice %296 {offsets = [0, 0], sizes = [2, 18], strides = [1, 1]} : vector<2x54xf32> to vector<2x18xf32>
    %298 = vector.extract_strided_slice %295 {offsets = [0, 0], sizes = [2, 18], strides = [1, 1]} : vector<2x54xf32> to vector<2x18xf32>
    %299 = arith.addf %297, %298 : vector<2x18xf32>
    %300 = arith.negf %299 : vector<2x18xf32>
    %301 = math.exp %300 : vector<2x18xf32>
    %cst_56 = arith.constant 1.000000e+00 : f32
    %302 = vector.broadcast %cst_56 : f32 to vector<2x18xf32>
    %303 = arith.addf %302, %301 : vector<2x18xf32>
    %304 = arith.divf %302, %303 : vector<2x18xf32>
    %305 = vector.extract_strided_slice %296 {offsets = [0, 18], sizes = [2, 18], strides = [1, 1]} : vector<2x54xf32> to vector<2x18xf32>
    %306 = vector.extract_strided_slice %295 {offsets = [0, 18], sizes = [2, 18], strides = [1, 1]} : vector<2x54xf32> to vector<2x18xf32>
    %307 = arith.addf %305, %306 : vector<2x18xf32>
    %308 = arith.negf %307 : vector<2x18xf32>
    %309 = math.exp %308 : vector<2x18xf32>
    %cst_57 = arith.constant 1.000000e+00 : f32
    %310 = vector.broadcast %cst_57 : f32 to vector<2x18xf32>
    %311 = arith.addf %310, %309 : vector<2x18xf32>
    %312 = arith.divf %310, %311 : vector<2x18xf32>
    %313 = vector.extract_strided_slice %296 {offsets = [0, 36], sizes = [2, 18], strides = [1, 1]} : vector<2x54xf32> to vector<2x18xf32>
    %314 = vector.extract_strided_slice %295 {offsets = [0, 36], sizes = [2, 18], strides = [1, 1]} : vector<2x54xf32> to vector<2x18xf32>
    %315 = arith.mulf %304, %314 : vector<2x18xf32>
    %316 = arith.addf %313, %315 : vector<2x18xf32>
    %317 = math.tanh %316 : vector<2x18xf32>
    %cst_58 = arith.constant 1.000000e+00 : f32
    %318 = vector.broadcast %cst_58 : f32 to vector<2x18xf32>
    %319 = arith.subf %318, %312 : vector<2x18xf32>
    %320 = arith.mulf %319, %317 : vector<2x18xf32>
    %321 = arith.mulf %312, %292 : vector<2x18xf32>
    %322 = arith.addf %320, %321 : vector<2x18xf32>
    %cst_59 = arith.constant dense<0.000000e+00> : vector<2x54xf32>
    %323 = tpu.matmul %322, %50, %cst_59 {dimension_numbers = #tpu.dot_dimension_numbers<[1], [0], [0], [1], [0, 0, 1, 1], [], []>} : vector<2x18xf32>, vector<18x54xf32>, vector<2x54xf32> -> vector<2x54xf32>
    %324 = vector.broadcast %51 : vector<1x54xf32> to vector<2x54xf32>
    %325 = arith.addf %323, %324 : vector<2x54xf32>
    %326 = vector.extract_strided_slice %49 {offsets = [0, 576], sizes = [2, 54], strides = [1, 1]} : vector<2x896xf32> to vector<2x54xf32>
    %327 = vector.extract_strided_slice %326 {offsets = [0, 0], sizes = [2, 18], strides = [1, 1]} : vector<2x54xf32> to vector<2x18xf32>
    %328 = vector.extract_strided_slice %325 {offsets = [0, 0], sizes = [2, 18], strides = [1, 1]} : vector<2x54xf32> to vector<2x18xf32>
    %329 = arith.addf %327, %328 : vector<2x18xf32>
    %330 = arith.negf %329 : vector<2x18xf32>
    %331 = math.exp %330 : vector<2x18xf32>
    %cst_60 = arith.constant 1.000000e+00 : f32
    %332 = vector.broadcast %cst_60 : f32 to vector<2x18xf32>
    %333 = arith.addf %332, %331 : vector<2x18xf32>
    %334 = arith.divf %332, %333 : vector<2x18xf32>
    %335 = vector.extract_strided_slice %326 {offsets = [0, 18], sizes = [2, 18], strides = [1, 1]} : vector<2x54xf32> to vector<2x18xf32>
    %336 = vector.extract_strided_slice %325 {offsets = [0, 18], sizes = [2, 18], strides = [1, 1]} : vector<2x54xf32> to vector<2x18xf32>
    %337 = arith.addf %335, %336 : vector<2x18xf32>
    %338 = arith.negf %337 : vector<2x18xf32>
    %339 = math.exp %338 : vector<2x18xf32>
    %cst_61 = arith.constant 1.000000e+00 : f32
    %340 = vector.broadcast %cst_61 : f32 to vector<2x18xf32>
    %341 = arith.addf %340, %339 : vector<2x18xf32>
    %342 = arith.divf %340, %341 : vector<2x18xf32>
    %343 = vector.extract_strided_slice %326 {offsets = [0, 36], sizes = [2, 18], strides = [1, 1]} : vector<2x54xf32> to vector<2x18xf32>
    %344 = vector.extract_strided_slice %325 {offsets = [0, 36], sizes = [2, 18], strides = [1, 1]} : vector<2x54xf32> to vector<2x18xf32>
    %345 = arith.mulf %334, %344 : vector<2x18xf32>
    %346 = arith.addf %343, %345 : vector<2x18xf32>
    %347 = math.tanh %346 : vector<2x18xf32>
    %cst_62 = arith.constant 1.000000e+00 : f32
    %348 = vector.broadcast %cst_62 : f32 to vector<2x18xf32>
    %349 = arith.subf %348, %342 : vector<2x18xf32>
    %350 = arith.mulf %349, %347 : vector<2x18xf32>
    %351 = arith.mulf %342, %322 : vector<2x18xf32>
    %352 = arith.addf %350, %351 : vector<2x18xf32>
    %cst_63 = arith.constant dense<0.000000e+00> : vector<2x54xf32>
    %353 = tpu.matmul %352, %50, %cst_63 {dimension_numbers = #tpu.dot_dimension_numbers<[1], [0], [0], [1], [0, 0, 1, 1], [], []>} : vector<2x18xf32>, vector<18x54xf32>, vector<2x54xf32> -> vector<2x54xf32>
    %354 = vector.broadcast %51 : vector<1x54xf32> to vector<2x54xf32>
    %355 = arith.addf %353, %354 : vector<2x54xf32>
    %356 = vector.extract_strided_slice %49 {offsets = [0, 640], sizes = [2, 54], strides = [1, 1]} : vector<2x896xf32> to vector<2x54xf32>
    %357 = vector.extract_strided_slice %356 {offsets = [0, 0], sizes = [2, 18], strides = [1, 1]} : vector<2x54xf32> to vector<2x18xf32>
    %358 = vector.extract_strided_slice %355 {offsets = [0, 0], sizes = [2, 18], strides = [1, 1]} : vector<2x54xf32> to vector<2x18xf32>
    %359 = arith.addf %357, %358 : vector<2x18xf32>
    %360 = arith.negf %359 : vector<2x18xf32>
    %361 = math.exp %360 : vector<2x18xf32>
    %cst_64 = arith.constant 1.000000e+00 : f32
    %362 = vector.broadcast %cst_64 : f32 to vector<2x18xf32>
    %363 = arith.addf %362, %361 : vector<2x18xf32>
    %364 = arith.divf %362, %363 : vector<2x18xf32>
    %365 = vector.extract_strided_slice %356 {offsets = [0, 18], sizes = [2, 18], strides = [1, 1]} : vector<2x54xf32> to vector<2x18xf32>
    %366 = vector.extract_strided_slice %355 {offsets = [0, 18], sizes = [2, 18], strides = [1, 1]} : vector<2x54xf32> to vector<2x18xf32>
    %367 = arith.addf %365, %366 : vector<2x18xf32>
    %368 = arith.negf %367 : vector<2x18xf32>
    %369 = math.exp %368 : vector<2x18xf32>
    %cst_65 = arith.constant 1.000000e+00 : f32
    %370 = vector.broadcast %cst_65 : f32 to vector<2x18xf32>
    %371 = arith.addf %370, %369 : vector<2x18xf32>
    %372 = arith.divf %370, %371 : vector<2x18xf32>
    %373 = vector.extract_strided_slice %356 {offsets = [0, 36], sizes = [2, 18], strides = [1, 1]} : vector<2x54xf32> to vector<2x18xf32>
    %374 = vector.extract_strided_slice %355 {offsets = [0, 36], sizes = [2, 18], strides = [1, 1]} : vector<2x54xf32> to vector<2x18xf32>
    %375 = arith.mulf %364, %374 : vector<2x18xf32>
    %376 = arith.addf %373, %375 : vector<2x18xf32>
    %377 = math.tanh %376 : vector<2x18xf32>
    %cst_66 = arith.constant 1.000000e+00 : f32
    %378 = vector.broadcast %cst_66 : f32 to vector<2x18xf32>
    %379 = arith.subf %378, %372 : vector<2x18xf32>
    %380 = arith.mulf %379, %377 : vector<2x18xf32>
    %381 = arith.mulf %372, %352 : vector<2x18xf32>
    %382 = arith.addf %380, %381 : vector<2x18xf32>
    %cst_67 = arith.constant dense<0.000000e+00> : vector<2x54xf32>
    %383 = tpu.matmul %382, %50, %cst_67 {dimension_numbers = #tpu.dot_dimension_numbers<[1], [0], [0], [1], [0, 0, 1, 1], [], []>} : vector<2x18xf32>, vector<18x54xf32>, vector<2x54xf32> -> vector<2x54xf32>
    %384 = vector.broadcast %51 : vector<1x54xf32> to vector<2x54xf32>
    %385 = arith.addf %383, %384 : vector<2x54xf32>
    %386 = vector.extract_strided_slice %49 {offsets = [0, 704], sizes = [2, 54], strides = [1, 1]} : vector<2x896xf32> to vector<2x54xf32>
    %387 = vector.extract_strided_slice %386 {offsets = [0, 0], sizes = [2, 18], strides = [1, 1]} : vector<2x54xf32> to vector<2x18xf32>
    %388 = vector.extract_strided_slice %385 {offsets = [0, 0], sizes = [2, 18], strides = [1, 1]} : vector<2x54xf32> to vector<2x18xf32>
    %389 = arith.addf %387, %388 : vector<2x18xf32>
    %390 = arith.negf %389 : vector<2x18xf32>
    %391 = math.exp %390 : vector<2x18xf32>
    %cst_68 = arith.constant 1.000000e+00 : f32
    %392 = vector.broadcast %cst_68 : f32 to vector<2x18xf32>
    %393 = arith.addf %392, %391 : vector<2x18xf32>
    %394 = arith.divf %392, %393 : vector<2x18xf32>
    %395 = vector.extract_strided_slice %386 {offsets = [0, 18], sizes = [2, 18], strides = [1, 1]} : vector<2x54xf32> to vector<2x18xf32>
    %396 = vector.extract_strided_slice %385 {offsets = [0, 18], sizes = [2, 18], strides = [1, 1]} : vector<2x54xf32> to vector<2x18xf32>
    %397 = arith.addf %395, %396 : vector<2x18xf32>
    %398 = arith.negf %397 : vector<2x18xf32>
    %399 = math.exp %398 : vector<2x18xf32>
    %cst_69 = arith.constant 1.000000e+00 : f32
    %400 = vector.broadcast %cst_69 : f32 to vector<2x18xf32>
    %401 = arith.addf %400, %399 : vector<2x18xf32>
    %402 = arith.divf %400, %401 : vector<2x18xf32>
    %403 = vector.extract_strided_slice %386 {offsets = [0, 36], sizes = [2, 18], strides = [1, 1]} : vector<2x54xf32> to vector<2x18xf32>
    %404 = vector.extract_strided_slice %385 {offsets = [0, 36], sizes = [2, 18], strides = [1, 1]} : vector<2x54xf32> to vector<2x18xf32>
    %405 = arith.mulf %394, %404 : vector<2x18xf32>
    %406 = arith.addf %403, %405 : vector<2x18xf32>
    %407 = math.tanh %406 : vector<2x18xf32>
    %cst_70 = arith.constant 1.000000e+00 : f32
    %408 = vector.broadcast %cst_70 : f32 to vector<2x18xf32>
    %409 = arith.subf %408, %402 : vector<2x18xf32>
    %410 = arith.mulf %409, %407 : vector<2x18xf32>
    %411 = arith.mulf %402, %382 : vector<2x18xf32>
    %412 = arith.addf %410, %411 : vector<2x18xf32>
    %cst_71 = arith.constant dense<0.000000e+00> : vector<2x54xf32>
    %413 = tpu.matmul %412, %50, %cst_71 {dimension_numbers = #tpu.dot_dimension_numbers<[1], [0], [0], [1], [0, 0, 1, 1], [], []>} : vector<2x18xf32>, vector<18x54xf32>, vector<2x54xf32> -> vector<2x54xf32>
    %414 = vector.broadcast %51 : vector<1x54xf32> to vector<2x54xf32>
    %415 = arith.addf %413, %414 : vector<2x54xf32>
    %416 = vector.extract_strided_slice %49 {offsets = [0, 768], sizes = [2, 54], strides = [1, 1]} : vector<2x896xf32> to vector<2x54xf32>
    %417 = vector.extract_strided_slice %416 {offsets = [0, 0], sizes = [2, 18], strides = [1, 1]} : vector<2x54xf32> to vector<2x18xf32>
    %418 = vector.extract_strided_slice %415 {offsets = [0, 0], sizes = [2, 18], strides = [1, 1]} : vector<2x54xf32> to vector<2x18xf32>
    %419 = arith.addf %417, %418 : vector<2x18xf32>
    %420 = arith.negf %419 : vector<2x18xf32>
    %421 = math.exp %420 : vector<2x18xf32>
    %cst_72 = arith.constant 1.000000e+00 : f32
    %422 = vector.broadcast %cst_72 : f32 to vector<2x18xf32>
    %423 = arith.addf %422, %421 : vector<2x18xf32>
    %424 = arith.divf %422, %423 : vector<2x18xf32>
    %425 = vector.extract_strided_slice %416 {offsets = [0, 18], sizes = [2, 18], strides = [1, 1]} : vector<2x54xf32> to vector<2x18xf32>
    %426 = vector.extract_strided_slice %415 {offsets = [0, 18], sizes = [2, 18], strides = [1, 1]} : vector<2x54xf32> to vector<2x18xf32>
    %427 = arith.addf %425, %426 : vector<2x18xf32>
    %428 = arith.negf %427 : vector<2x18xf32>
    %429 = math.exp %428 : vector<2x18xf32>
    %cst_73 = arith.constant 1.000000e+00 : f32
    %430 = vector.broadcast %cst_73 : f32 to vector<2x18xf32>
    %431 = arith.addf %430, %429 : vector<2x18xf32>
    %432 = arith.divf %430, %431 : vector<2x18xf32>
    %433 = vector.extract_strided_slice %416 {offsets = [0, 36], sizes = [2, 18], strides = [1, 1]} : vector<2x54xf32> to vector<2x18xf32>
    %434 = vector.extract_strided_slice %415 {offsets = [0, 36], sizes = [2, 18], strides = [1, 1]} : vector<2x54xf32> to vector<2x18xf32>
    %435 = arith.mulf %424, %434 : vector<2x18xf32>
    %436 = arith.addf %433, %435 : vector<2x18xf32>
    %437 = math.tanh %436 : vector<2x18xf32>
    %cst_74 = arith.constant 1.000000e+00 : f32
    %438 = vector.broadcast %cst_74 : f32 to vector<2x18xf32>
    %439 = arith.subf %438, %432 : vector<2x18xf32>
    %440 = arith.mulf %439, %437 : vector<2x18xf32>
    %441 = arith.mulf %432, %412 : vector<2x18xf32>
    %442 = arith.addf %440, %441 : vector<2x18xf32>
    %cst_75 = arith.constant dense<0.000000e+00> : vector<2x54xf32>
    %443 = tpu.matmul %442, %50, %cst_75 {dimension_numbers = #tpu.dot_dimension_numbers<[1], [0], [0], [1], [0, 0, 1, 1], [], []>} : vector<2x18xf32>, vector<18x54xf32>, vector<2x54xf32> -> vector<2x54xf32>
    %444 = vector.broadcast %51 : vector<1x54xf32> to vector<2x54xf32>
    %445 = arith.addf %443, %444 : vector<2x54xf32>
    %446 = vector.extract_strided_slice %49 {offsets = [0, 832], sizes = [2, 54], strides = [1, 1]} : vector<2x896xf32> to vector<2x54xf32>
    %447 = vector.extract_strided_slice %446 {offsets = [0, 0], sizes = [2, 18], strides = [1, 1]} : vector<2x54xf32> to vector<2x18xf32>
    %448 = vector.extract_strided_slice %445 {offsets = [0, 0], sizes = [2, 18], strides = [1, 1]} : vector<2x54xf32> to vector<2x18xf32>
    %449 = arith.addf %447, %448 : vector<2x18xf32>
    %450 = arith.negf %449 : vector<2x18xf32>
    %451 = math.exp %450 : vector<2x18xf32>
    %cst_76 = arith.constant 1.000000e+00 : f32
    %452 = vector.broadcast %cst_76 : f32 to vector<2x18xf32>
    %453 = arith.addf %452, %451 : vector<2x18xf32>
    %454 = arith.divf %452, %453 : vector<2x18xf32>
    %455 = vector.extract_strided_slice %446 {offsets = [0, 18], sizes = [2, 18], strides = [1, 1]} : vector<2x54xf32> to vector<2x18xf32>
    %456 = vector.extract_strided_slice %445 {offsets = [0, 18], sizes = [2, 18], strides = [1, 1]} : vector<2x54xf32> to vector<2x18xf32>
    %457 = arith.addf %455, %456 : vector<2x18xf32>
    %458 = arith.negf %457 : vector<2x18xf32>
    %459 = math.exp %458 : vector<2x18xf32>
    %cst_77 = arith.constant 1.000000e+00 : f32
    %460 = vector.broadcast %cst_77 : f32 to vector<2x18xf32>
    %461 = arith.addf %460, %459 : vector<2x18xf32>
    %462 = arith.divf %460, %461 : vector<2x18xf32>
    %463 = vector.extract_strided_slice %446 {offsets = [0, 36], sizes = [2, 18], strides = [1, 1]} : vector<2x54xf32> to vector<2x18xf32>
    %464 = vector.extract_strided_slice %445 {offsets = [0, 36], sizes = [2, 18], strides = [1, 1]} : vector<2x54xf32> to vector<2x18xf32>
    %465 = arith.mulf %454, %464 : vector<2x18xf32>
    %466 = arith.addf %463, %465 : vector<2x18xf32>
    %467 = math.tanh %466 : vector<2x18xf32>
    %cst_78 = arith.constant 1.000000e+00 : f32
    %468 = vector.broadcast %cst_78 : f32 to vector<2x18xf32>
    %469 = arith.subf %468, %462 : vector<2x18xf32>
    %470 = arith.mulf %469, %467 : vector<2x18xf32>
    %471 = arith.mulf %462, %442 : vector<2x18xf32>
    %472 = arith.addf %470, %471 : vector<2x18xf32>
    %c176 = arith.constant 176 : index
    %c0_79 = arith.constant 0 : index
    %473 = vector.load %arg2[%c176, %c0_79] : memref<208x896xf32, #tpu.memory_space<vmem>>, vector<18x4xf32>
    %c203 = arith.constant 203 : index
    %c0_80 = arith.constant 0 : index
    %474 = vector.load %arg2[%c203, %c0_80] : memref<208x896xf32, #tpu.memory_space<vmem>>, vector<1x4xf32>
    %cst_81 = arith.constant dense<0.000000e+00> : vector<2x4xf32>
    %475 = tpu.matmul %472, %473, %cst_81 {dimension_numbers = #tpu.dot_dimension_numbers<[1], [0], [0], [1], [0, 0, 1, 1], [], []>} : vector<2x18xf32>, vector<18x4xf32>, vector<2x4xf32> -> vector<2x4xf32>
    %476 = vector.broadcast %474 : vector<1x4xf32> to vector<2x4xf32>
    %477 = arith.addf %475, %476 : vector<2x4xf32>
    %478 = arith.addf %477, %44 : vector<2x4xf32>
    %479 = vector.shape_cast %24 : vector<2x4x1xf32> to vector<2x4xf32>
    %480 = tpu.concatenate %478, %479 in 1 : vector<2x4xf32>, vector<2x4xf32> -> vector<2x8xf32>
    %c0_82 = arith.constant 0 : index
    %c0_83 = arith.constant 0 : index
    %481 = vector.load %arg3[%c0_82, %c0_83] : memref<2x8xf32, #tpu.memory_space<vmem>>, vector<2x8xf32>
    tpu.vector_store %arg3[%c0_82, %c0_83], %480 {strides = array<i32>} : memref<2x8xf32, #tpu.memory_space<vmem>>, vector<2x8xf32>,
    return
  }
}

</mosaic_0001>

<bundles_post_ra>
// kernel: lstnet_forward.1
= control target key start
LH: loop header
LB: loop body
LE: loop exit
PB: predicated region body
PF: predicated region fallthrough
CT: control target
= control target key end

     0   :  { %8 = vsyncpa [#allocation3], 0  ;;  %s2786_s12 = smov [#allocation2]   ;;  %s3158_s0 = inlined_call_operand.vmem [shape: f32[2,4,16], index: 0, kind: input, shape index: {}]   ;;  %s3159_s1 = inlined_call_operand.vmem [shape: f32[2,4,16], index: 1, kind: input, shape index: {}]   ;;  %s3160_s2 = inlined_call_operand.hbm [shape: f32[208,896], index: 2, kind: input, shape index: {}]   ;;  %s3161_s3 = inlined_call_operand.vmem [shape: f32[2,8], index: 3, kind: output, shape index: {}]  }
   0x1   :  { %s18_s13 = sshll.u32 %s2786_s12, 4  ;;  %s2762_s16 = scalar_lea.hbm %s3160_s2, 23296  ;;  %s19_s13 = int_to_ptr.vmem [resolvable:$true] %s18_s13 }
   0x2   :  { %p2763_p0 = scmp.ne.s32.totalorder %s3160_s2, %s2762_s16  ;;  %p2766_p1 = scmp.lt.u32.totalorder %s2762_s16, %s3160_s2 }
   0x4   :  { %p2768_p2 = pnand %p2766_p1, %p2763_p0 }
   0x6   :  { %2771 = shalt.err (!%p2768_p2)
}
   0x7   :  { %s2772_s21 = scalar_lea.vmem %s19_s13, 23296  ;;  %p2777_p4 = scmp.lt.s32.totalorder %s19_s13, %s19_s13 }
   0x8   :  { %p2773_p3 = scmp.ne.s32.totalorder %s19_s13, %s2772_s21  ;;  %p2778_p5 = scmp.lt.s32.totalorder %s2772_s21, %s2772_s21 }
   0xa   :  { %p2779_p6 = por %p2778_p5, %p2777_p4 }
   0xc   :  { %p2780_p7 = pnand %p2779_p6, %p2773_p3 }
   0xe   :  { %2783 = shalt.err (!%p2780_p7)
}
   0xf   :  { %s2787_s22 = smov 896   ;;  %s2788_s23 = smov 56  }
  0x10   :  { %24 = dma.hbm_to_vmem [thread:$0]  %s3160_s2, 23296, %s19_s13, [#allocation3], %s2787_s22, %s2787_s22, %s2788_s23  }
  0x11   :  { %2784 = dma.done.wait [#allocation3], 23296  }
  0x12   :  { %2785 = vsyncadd [#allocation3], 4294944000  ;;  %vm32_vm0 = vcmask 125952   ;;  %v30_v0 = vld [vmem:[%s3159_s1] sm:$0xf]  ;;  %v104_v12 = vld [vmem:[#allocation2] sm:$0xff]  ;;  %v270_v31 = vlaneseq }
  0x13   :  { %v31_v1 = vld [vmem:[%s3159_s1 + $0x4] sm:$0xf]  ;;  %v2843_v2 = vld [vmem:[%s3158_s0] sm:$0xf]  ;;  %v33_v3 = vsel %vm32_vm0, %v30_v0, 0.0  ;;  %v105_v13 = vld [vmem:[#allocation2 + $0x38] sm:$0xff] }
  0x14   :  { %v39_v4 = vand.u32 2147483647, %v2843_v2  ;;  %v2849_v5 = vld [vmem:[%s3158_s0 + $0x4] sm:$0xf]  ;;  %34 = vadd.xlane.f32.xlu0 %v33_v3  ;;  %v36_v7 = vsel %vm32_vm0, %v31_v1, 0.0  ;;  %v106_v14 = vld [vmem:[#allocation2 + $0x70] sm:$0xff]  ;;  %v2521_v16 = vpack.c.bf16 %v105_v13, %v104_v12 }
  0x15   :  { %v40_v6 = vand.u32 2147483647, %v2849_v5  ;;  %v2789_v15 = vmov 0.0|0.0   ;;  %v107_v17 = vld [vmem:[#allocation2 + $0xa8] sm:$0xff]  ;;  %v108_v19 = vld [vmem:[#allocation2 + $0xe0] sm:$0xff]  ;;  %v109_v20 = vld [vmem:[#allocation2 + $0x118] sm:$0xff] }
  0x16   :  { %v41_v8 = vmul.f32 %v39_v4, %v30_v0  ;;  %2520 = vmatprep.subr.bf16.mxu0 %v2789_v15  ;;  %v2524_v18 = vpack.c.bf16 %v107_v17, %v106_v14  ;;  %v2527_v21 = vpack.c.bf16 %v109_v20, %v108_v19  ;;  %vm49_vm1 = vcmask 1043456   ;;  %v110_v53 = vld [vmem:[#allocation2 + $0x150] sm:$0xff]  ;;  %v111_v54 = vld [vmem:[#allocation2 + $0x188] sm:$0xff]  ;;  %v196_v58 = vld [vmem:[#allocation2 + $0x200] sm:$0xff]  ;;  %s2792_s0 = smov 16   ;;  %s2793_s1 = smov 32  }
  0x17   :  { %v42_v9 = vmul.f32 %v40_v6, %v31_v1  ;;  %2522 = vmatpush3.bf16.msra.mxu0 %v2521_v16  ;;  %v2184_v33 = vand.u32 127, %v270_v31  ;;  %v2860_v38 = vshrl.u32 %v270_v31, 7  ;;  %vm78_vm4 = vcmask 1041409   ;;  %v189_v57 = vld [vmem:[#allocation2 + $0x1c8] sm:$0xff]  ;;  %v191_v59 = vld [vmem:[#allocation2 + $0x1d8] sm:$0xff]  ;;  %v198_v62 = vld [vmem:[#allocation2 + $0x210] sm:$0xff] }
  0x18   :  { %v43_v10 = vsel %vm32_vm0, %v41_v8, 0.0  ;;  %37 = vadd.xlane.f32.xlu0 %v36_v7  ;;  %2523 = vmatprep.subr.bf16.mxu0 %v2789_v15  ;;  %v2530_v55 = vpack.c.bf16 %v111_v54, %v110_v53  ;;  %vm2790_vm5 = vmmov 0   ;;  %v2791_v56 = vmov 0.0   ;;  %v188_v63 = vld [vmem:[#allocation2 + $0x1c0] sm:$0xff]  ;;  %v195_v0 = vld [vmem:[#allocation2 + $0x1f8] sm:$0xff]  ;;  %v202_v13 = vld [vmem:[#allocation2 + $0x230] sm:$0xff] }
  0x19   :  { %44 = vadd.xlane.f32.xlu1 %v43_v10  ;;  %v46_v11 = vsel %vm32_vm0, %v42_v9, 0.0  ;;  %v2185_v39 = vadd.s32 4294967292, %v2184_v33  ;;  %2357 = vmatprep.mubr.msk.f32.mxu0 %vm2790_vm5, %v2791_v56  ;;  %v2532_v61 = vpack.c.bf16 %v196_v58, %v189_v57  ;;  %v2552_v4 = vpack.c.bf16 %v198_v62, %v191_v59  ;;  %v203_v7 = vld [vmem:[#allocation2 + $0x238] sm:$0xff]  ;;  %v210_v9 = vld [vmem:[#allocation2 + $0x270] sm:$0xff]  ;;  %v209_v14 = vld [vmem:[#allocation2 + $0x268] sm:$0xff]  ;;  %s2794_s6 = smov 48  }
  0x1a   :  { %394 = vmatprep.mubr.f32.mxu1 %v2791_v56  ;;  %v2534_v6 = vpack.c.bf16 %v195_v0, %v188_v63  ;;  %v2536_v12 = vpack.c.bf16 %v210_v9, %v203_v7  ;;  %v224_v19 = vld [vmem:[#allocation2 + $0x2e0] sm:$0xff]  ;;  %v2538_v20 = vpack.c.bf16 %v209_v14, %v202_v13  ;;  %v230_v31 = vld [vmem:[#allocation2 + $0x310] sm:$0xff]  ;;  %vm98_vm6 = vcmask 130048   ;;  %v219_v58 = vld [vmem:[#allocation2 + $0x2b8] sm:$0xff]  ;;  %s2795_s7 = smov 92   ;;  %s2796_s8 = smov 36  }
  0x1b   :  { %2525 = vmatpush3.bf16.msra.mxu0 %v2524_v18  ;;  %v2188_v45 = vsub.s32 %v2185_v39, %v2860_v38  ;;  %2533 = vmatprep.subr.bf16.mxu1 %v2532_v61  ;;  %v217_v18 = vld [vmem:[#allocation2 + $0x2a8] sm:$0xff]  ;;  %v244_v39 = vld [vmem:[#allocation2 + $0x380] sm:$0xff]  ;;  %vm100_vm7 = vcmask 261120   ;;  %vm102_vm8 = vcmask 392192   ;;  %vm113_vm9 = vcmask 523264   ;;  %v226_v59 = vld [vmem:[#allocation2 + $0x2f0] sm:$0xff] }
  0x1c   :  { %2526 = vmatprep.subr.bf16.mxu0 %v2789_v15  ;;  %2535 = vmatpush1.bf16.msra.mxu1 %v2534_v6  ;;  %v204_v54 = vld [vmem:[#allocation2 + $0x240] sm:$0xff]  ;;  %v2560_v61 = vpack.c.bf16 %v226_v59, %v219_v58  ;;  %v218_v62 = vld [vmem:[#allocation2 + $0x2b0] sm:$0xff]  ;;  %v225_v63 = vld [vmem:[#allocation2 + $0x2e8] sm:$0xff]  ;;  %vm305_vm10 = vcmask 687104   ;;  %vm621_vm11 = vcmask 1041408   ;;  %s2797_s9 = smov 110  }
  0x1d   :  { %47 = vadd.xlane.f32.xlu1 %v46_v11  ;;  %2537 = vmatprep.subr.bf16.mxu1 %v2536_v12  ;;  %v233_v0 = vld [vmem:[#allocation2 + $0x328] sm:$0xff]  ;;  %v232_v6 = vld [vmem:[#allocation2 + $0x320] sm:$0xff]  ;;  %v239_v7 = vld [vmem:[#allocation2 + $0x358] sm:$0xff]  ;;  %vm617_vm12 = vcmask 146432   ;;  %s2798_s10 = smov 28   ;;  %s2799_s11 = smov 64  }
  0x1e   :  { %v254_v9 = vld [vmem:[#allocation2 + $0x3d0] sm:$0xff]  ;;  %v253_v13 = vld [vmem:[#allocation2 + $0x3c8] sm:$0xff]  ;;  %v236_v58 = vld [vmem:[#allocation2 + $0x340] sm:$0xff]  ;;  %s2800_s12 = smov 46   ;;  %s2801_s13 = smov 44   ;;  %vm2196_vm13 = vcmask 31744  }
  0x1f   :  { %2528 = vmatpush3.bf16.msra.mxu0 %v2527_v21  ;;  %v2540_v21 = vpack.c.bf16 %v224_v19, %v217_v18  ;;  %v246_v12 = vld [vmem:[#allocation2 + $0x390] sm:$0xff]  ;;  %v193_v18 = vld [vmem:[#allocation2 + $0x1e8] sm:$0xff]  ;;  %v243_v59 = vld [vmem:[#allocation2 + $0x378] sm:$0xff]  ;;  %vm2198_vm14 = vcmask 58368  }
  0x20   :  { %2529 = vmatprep.subr.bf16.mxu0 %v2789_v15  ;;  %2539 = vmatpush1.bf16.msra.mxu1 %v2538_v20  ;;  %v2570_v14 = vpack.c.bf16 %v253_v13, %v246_v12  ;;  %v258_v19 = vld [vmem:[#allocation2 + $0x3f0] sm:$0xf]  ;;  %v200_v20 = vld [vmem:[#allocation2 + $0x220] sm:$0xff] }
  0x21   :  { %2541 = vmatprep.subr.bf16.mxu1 %v2540_v21  ;;  %v2572_v21 = vpack.c.bf16 %v200_v20, %v193_v18  ;;  %v262_v12 = vld [vmem:[#allocation2 + $0x410] sm:$0xf]  ;;  %v264_v13 = vld [vmem:[#allocation2 + $0x420] sm:$0xf] }
  0x23   :  { %2531 = vmatpush3.bf16.msra.mxu0 %v2530_v55  ;;  %v211_v55 = vld [vmem:[#allocation2 + $0x278] sm:$0xff] }
  0x24   :  { %2553 = vmatprep.subr.bf16.mxu0 %v2552_v4 }
  0xa1   :  { %v35_v22 = vpop.xlane.xlu0 %34 }
  0xa2   :  { %v59_v23 = vmax.f32 %v35_v22, 1.0  ;;  %v50_v25 = vsel %vm49_vm1, %v35_v22, 0.0  ;;  %v216_v22 = vld [vmem:[#allocation2 + $0x2a0] sm:$0xff] }
  0xa4   :  { %2668 = vrcp.f32 %v59_v23 }
  0xa5   :  { %v38_v24 = vpop.xlane.xlu0 %37 }
  0xa6   :  { %v51_v26 = vsel %vm49_vm1, %v38_v24, 0.0  ;;  %v60_v27 = vmax.f32 %v38_v24, 1.0  ;;  %v45_v29 = vpop.xlane.xlu1 %44 }
  0xa7   :  { %v52_v28 = vadd.f32 %v51_v26, %v50_v25  ;;  %v53_v34 = vsel %vm49_vm1, %v45_v29, 0.0  ;;  %vm65_vm2 = vcmp.gt.f32.partialorder %v45_v29, 0.0  ;;  %v223_v26 = vld [vmem:[#allocation2 + $0x2d8] sm:$0xff] }
  0xa8   :  { %2670 = vrcp.f32 %v60_v27  ;;  %v2542_v27 = vpack.c.bf16 %v223_v26, %v216_v22  ;;  %v112_v22 = vld [vmem:[#allocation2 + $0x578] ss:$0 sm:$0xff] }
  0xa9   :  { %v56_v30 = vmax.f32 %v52_v28, 1.0  ;;  %v231_v28 = vld [vmem:[#allocation2 + $0x318] sm:$0xff] }
  0xaa   :  { %v48_v32 = vpop.xlane.xlu1 %47  ;;  %2543 = vmatpush1.bf16.msra.mxu1 %v2542_v27  ;;  %v207_v27 = vld [vmem:[#allocation2 + $0x258] sm:$0xff] }
  0xab   :  { %2672 = vrcp.f32 %v56_v30  ;;  %v54_v35 = vsel %vm49_vm1, %v48_v32, 0.0  ;;  %vm66_vm3 = vcmp.gt.f32.partialorder %v48_v32, 0.0 }
  0xac   :  { %v55_v40 = vadd.f32 %v54_v35, %v53_v34  ;;  %v245_v35 = vld [vmem:[#allocation2 + $0x388] sm:$0xff] }
  0xae   :  { %v2669_v36 = vpop.eup %2668 }
  0xaf   :  { %v62_v42 = vmul.f32 %v2669_v36, %v45_v29  ;;  %v238_v29 = vld [vmem:[#allocation2 + $0x350] sm:$0xff]  ;;  %v252_v36 = vld [vmem:[#allocation2 + $0x3c0] sm:$0xff] }
  0xb0   :  { %v2544_v30 = vpack.c.bf16 %v238_v29, %v231_v28  ;;  %v214_v28 = vld [vmem:[#allocation2 + $0x290] sm:$0xff] }
  0xb2   :  { %v2671_v37 = vpop.eup %2670  ;;  %2545 = vmatprep.subr.bf16.mxu1 %v2544_v30 }
  0xb3   :  { %v64_v44 = vmul.f32 %v2671_v37, %v48_v32  ;;  %v237_v32 = vld [vmem:[#allocation2 + $0x348] sm:$0xff]  ;;  %v2548_v37 = vpack.c.bf16 %v252_v36, %v245_v35  ;;  %v2576_v35 = vpack.c.bf16 %v214_v28, %v207_v27 }
  0xb4   :  { %v2546_v34 = vpack.c.bf16 %v237_v32, %v230_v31  ;;  %v213_v36 = vld [vmem:[#allocation2 + $0x288] sm:$0xff] }
  0xb5   :  { %v2673_v41 = vpop.eup %2672  ;;  %v266_v27 = vld [vmem:[#allocation2 + $0x579] ss:$8 sm:$0xf] }
  0xb6   :  { %v58_v43 = vmul.f32 %v2673_v41, %v55_v40  ;;  %v251_v40 = vld [vmem:[#allocation2 + $0x3b8] sm:$0xff]  ;;  %2547 = vmatpush1.bf16.msra.mxu1 %v2546_v34 }
  0xb7   :  { %v2550_v41 = vpack.c.bf16 %v251_v40, %v244_v39  ;;  %2549 = vmatprep.subr.bf16.mxu1 %v2548_v37  ;;  %v208_v37 = vld [vmem:[#allocation2 + $0x260] sm:$0xff]  ;;  %v215_v39 = vld [vmem:[#allocation2 + $0x298] sm:$0xff]  ;;  %v221_v40 = vld [vmem:[#allocation2 + $0x2c8] sm:$0xff] }
  0xb8   :  { %v67_v46 = vsel %vm65_vm2, %v62_v42, %v58_v43  ;;  %v68_v47 = vsel %vm66_vm3, %v64_v44, %v58_v43  ;;  %v190_v44 = vld [vmem:[#allocation2 + $0x1d0] sm:$0xff] }
  0xb9   :  { %v69_v48 = vmax.f32 %v67_v46, 1e-10  ;;  %v70_v49 = vmax.f32 %v68_v47, 1e-10  ;;  %v205_v47 = vld [vmem:[#allocation2 + $0x248] sm:$0xff] }
  0xba   :  { %2551 = vmatpush1.bf16.msra.mxu1 %v2550_v41  ;;  %v228_v41 = vld [vmem:[#allocation2 + $0x300] sm:$0xff] }
  0xbb   :  { %2674 = vrcp.f32 %v69_v48  ;;  %v2189_v50 = vrot.slane %v69_v48, %v2188_v45  ;;  %v2193_v51 = vrot.slane %v70_v49, %v2188_v45  ;;  %v197_v45 = vld [vmem:[#allocation2 + $0x208] sm:$0xff]  ;;  %v212_v48 = vld [vmem:[#allocation2 + $0x280] sm:$0xff] }
  0xbc   :  { %2676 = vrcp.f32 %v70_v49  ;;  %v2554_v49 = vpack.c.bf16 %v197_v45, %v190_v44  ;;  %v2556_v53 = vpack.c.bf16 %v212_v48, %v205_v47  ;;  %v220_v44 = vld [vmem:[#allocation2 + $0x2c0] sm:$0xff]  ;;  %v2580_v45 = vpack.c.bf16 %v228_v41, %v221_v40  ;;  %v222_v47 = vld [vmem:[#allocation2 + $0x2d0] sm:$0xff]  ;;  %v229_v48 = vld [vmem:[#allocation2 + $0x308] sm:$0xff] }
  0xbd   :  { %v2864_v52 = vsel %vm78_vm4, %v2193_v51, %v2189_v50  ;;  %v267_v28 = vld [vmem:[#allocation2 + $0x579] ss:$8 sm:$0xf0] }
  0xc5   :  { %v2675_v60 = vpop.eup %2674 }
  0xc6   :  { %v2677_v1 = vpop.eup %2676  ;;  %v72_v3 = vmul.f32 %v2675_v60, %v2843_v2  ;;  %v2558_v60 = vpack.c.bf16 %v211_v55, %v204_v54  ;;  %v234_v54 = vld [vmem:[#allocation2 + $0x330] sm:$0xff] }
  0xc7   :  { %v74_v8 = vmul.f32 %v2677_v1, %v2849_v5  ;;  %v240_v1 = vld [vmem:[#allocation2 + $0x360] sm:$0xff] }
  0xc8   :  { %v86_v10 = vrot.slane %v72_v3, 2  ;;  %v81_v11 = vrot.slane %v72_v3, 1  ;;  %v92_v23 = vrot.slane %v72_v3, 3  ;;  %v2564_v4 = vpack.c.bf16 %v240_v1, %v233_v0  ;;  %v248_v0 = vld [vmem:[#allocation2 + $0x3a0] sm:$0xff] }
  0xc9   :  { %v87_v16 = vrot.slane %v74_v8, 1  ;;  %v77_v17 = vrot.slane %v74_v8, 7  ;;  %v93_v24 = vrot.slane %v74_v8, 2 }
  0xca   :  { %v82_v2 = vsel %vm78_vm4, %v74_v8, %v81_v11  ;;  %v247_v8 = vld [vmem:[#allocation2 + $0x398] sm:$0xff] }
  0xcb   :  { %v88_v5 = vsel %vm78_vm4, %v87_v16, %v86_v10  ;;  %83 = vrot.lane.b32.xlu0 %v82_v2, %s2792_s0  ;;  %v79_v25 = vsel %vm78_vm4, %v77_v17, %v72_v3  ;;  %v94_v33 = vsel %vm78_vm4, %v93_v24, %v92_v23  ;;  %v2562_v3 = vpack.c.bf16 %v225_v63, %v218_v62  ;;  %v259_v16 = vld [vmem:[#allocation2 + $0x3f8] sm:$0xf]  ;;  %v261_v17 = vld [vmem:[#allocation2 + $0x408] sm:$0xf]  ;;  %v260_v2 = vld [vmem:[#allocation2 + $0x400] sm:$0xf] }
  0xcc   :  { %89 = vrot.lane.b32.xlu1 %v88_v5, %s2793_s1  ;;  %v2566_v10 = vpack.c.bf16 %v239_v7, %v232_v6  ;;  %v2568_v11 = vpack.c.bf16 %v254_v9, %v247_v8  ;;  %2206 = vmatprep.subr.msk.mxu1 %vm49_vm1, %v259_v16  ;;  %v192_v5 = vld [vmem:[#allocation2 + $0x1e0] sm:$0xff]  ;;  %v199_v23 = vld [vmem:[#allocation2 + $0x218] sm:$0xff]  ;;  %v194_v24 = vld [vmem:[#allocation2 + $0x1f0] sm:$0xff]  ;;  %v2602_v63 = vpack.c.bf16 %v243_v59, %v236_v58 }
  0xcd   :  { %2207 = vmatpush1.msk.msra.mxu1 %vm49_vm1, %v258_v19  ;;  %v2574_v31 = vpack.c.bf16 %v199_v23, %v192_v5  ;;  %v257_v6 = vld [vmem:[#allocation2 + $0x3e8] sm:$0xff]  ;;  %v263_v9 = vld [vmem:[#allocation2 + $0x418] sm:$0xf] }
  0xce   :  { %2573 = vmatprep.subr.bf16.mxu1 %v2572_v21  ;;  %v2913_v16 = vld [vmem:[#allocation2 + $0x498] sm:$0x3]  ;;  %v2945_v23 = vld [vmem:[#allocation2 + $0x57a] ss:$0 sm:$0xff] }
  0xd0   :  { %95 = vrot.lane.b32.xlu1 %v94_v33, %s2794_s6  ;;  %v206_v33 = vld [vmem:[#allocation2 + $0x250] sm:$0xff] }
 0x13d   :  { %v84_v42 = vpop.permute.xlu0 %83 }
 0x13e   :  { %v90_v43 = vpop.permute.xlu1 %89  ;;  %v99_v46 = vsel %vm98_vm6, %v79_v25, %v84_v42  ;;  %v201_v25 = vld [vmem:[#allocation2 + $0x228] sm:$0xff]  ;;  %v2578_v42 = vpack.c.bf16 %v213_v36, %v206_v33 }
 0x13f   :  { %v101_v51 = vsel %vm100_vm7, %v99_v46, %v90_v43  ;;  %v2593_v32 = vpack.c.bf16 %v201_v25, %v194_v24  ;;  %v2596_v43 = vpack.c.bf16 %v215_v39, %v208_v37  ;;  %v227_v46 = vld [vmem:[#allocation2 + $0x2f8] sm:$0xff] }
 0x142   :  { %v96_v50 = vpop.permute.xlu1 %95 }
 0x143   :  { %v103_v57 = vsel %vm102_vm8, %v101_v51, %v96_v50  ;;  %v242_v50 = vld [vmem:[#allocation2 + $0x370] sm:$0xff]  ;;  %v2582_v51 = vpack.c.bf16 %v227_v46, %v220_v44 }
 0x144   :  { %2358 = vmatmul.mubr.msk.f32.vlgmr.msra.gmra.mrb[0].mxu0 %vm113_vm9, %v103_v57  ;;  %v241_v57 = vld [vmem:[#allocation2 + $0x368] sm:$0xff] }
 0x145   :  { %2555 = vmatpush1.bf16.msra.mxu0 %v2554_v49  ;;  %465 = vmatprep.mubr.f32.mxu0 %v2791_v56  ;;  %v235_v49 = vld [vmem:[#allocation2 + $0x338] sm:$0xff]  ;;  %v2586_v62 = vpack.c.bf16 %v241_v57, %v234_v54 }
 0x146   :  { %2557 = vmatprep.subr.bf16.mxu0 %v2556_v53  ;;  %v2599_v53 = vpack.c.bf16 %v229_v48, %v222_v47  ;;  %v2584_v55 = vpack.c.bf16 %v242_v50, %v235_v49 }
 0x149   :  { %2559 = vmatpush1.bf16.msra.mxu0 %v2558_v60  ;;  %v249_v60 = vld [vmem:[#allocation2 + $0x3a8] sm:$0xff] }
 0x14a   :  { %2561 = vmatprep.subr.bf16.mxu0 %v2560_v61  ;;  %v256_v61 = vld [vmem:[#allocation2 + $0x3e0] sm:$0xff] }
 0x14b   :  { %v2588_v1 = vpack.c.bf16 %v256_v61, %v249_v60 }
 0x14d   :  { %2563 = vmatpush1.bf16.msra.mxu0 %v2562_v3  ;;  %v255_v3 = vld [vmem:[#allocation2 + $0x3d8] sm:$0xff] }
 0x14e   :  { %2565 = vmatprep.subr.bf16.mxu0 %v2564_v4  ;;  %v250_v4 = vld [vmem:[#allocation2 + $0x3b0] sm:$0xff]  ;;  %v2590_v7 = vpack.c.bf16 %v255_v3, %v248_v0 }
 0x14f   :  { %v2605_v8 = vpack.c.bf16 %v257_v6, %v250_v4 }
 0x151   :  { %2567 = vmatpush1.bf16.msra.mxu0 %v2566_v10  ;;  %v613_v10 = vld [vmem:[#allocation2 + $0x428] sm:$0xff] }
 0x152   :  { %2569 = vmatprep.subr.bf16.mxu0 %v2568_v11  ;;  %v614_v11 = vld [vmem:[#allocation2 + $0x460] sm:$0xff] }
 0x155   :  { %2571 = vmatpush1.bf16.msra.mxu0 %v2570_v14  ;;  %v2899_v14 = vpack.c.bf16 %v614_v11, %v613_v10 }
 0x156   :  { %2209 = vmatprep.subr.msk.mxu0 %vm49_vm1, %v261_v17 }
 0x159   :  { %2210 = vmatpush1.msk.msra.mxu0 %vm49_vm1, %v260_v2 }
 0x15a   :  { %2592 = vmatprep.subr.bf16.mxu0 %v2789_v15 }
 0x217   :  { %v183_v26 = vpop.f32.mrb[0].mxu0 }
 0x218   :  { %v2881_v29 = vadd.f32 %v183_v26, %v112_v22  ;;  %v2359_v30 = vpop.f32.mrb[1].mxu0 }
 0x219   :  { %v2949_v30 = vor.u32 %v267_v28, %v266_v27 }
 0x21a   :  { %v2884_v34 = vmax.f32 %v2881_v29, 0.0 }
 0x21c   :  { %2208 = vmatmul.mubr.msk.f32.vlgmr.msra.gmra.mrb[0].mxu1 %vm305_vm10, %v2884_v34  ;;  %2211 = vmatmul.mubr.msk.f32.vlgmr.msra.gmra.mrb[2].mxu0 %vm305_vm10, %v2884_v34 }
 0x21d   :  { %2575 = vmatpush1.bf16.msra.mxu1 %v2574_v31  ;;  %2594 = vmatpush3.bf16.msra.mxu0 %v2593_v32  ;;  %v272_v31 = vsub.s32 0, %v2860_v38 }
 0x21e   :  { %2577 = vmatprep.subr.bf16.mxu1 %v2576_v35  ;;  %2595 = vmatprep.subr.bf16.mxu0 %v2789_v15 }
 0x21f   :  { %536 = vmatprep.mubr.f32.mxu1 %v2791_v56  ;;  %2382 = vmatprep.mubr.msk.f32.mxu0 %vm2790_vm5, %v2791_v56  ;;  %v273_v32 = vrot.slane %v2949_v30, %v272_v31 }
 0x221   :  { %2579 = vmatpush1.bf16.msra.mxu1 %v2578_v42  ;;  %2597 = vmatpush3.bf16.msra.mxu0 %v2596_v43 }
 0x222   :  { %2581 = vmatprep.subr.bf16.mxu1 %v2580_v45  ;;  %2598 = vmatprep.subr.bf16.mxu0 %v2789_v15 }
 0x225   :  { %2583 = vmatpush1.bf16.msra.mxu1 %v2582_v51  ;;  %2600 = vmatpush3.bf16.msra.mxu0 %v2599_v53 }
 0x226   :  { %2585 = vmatprep.subr.bf16.mxu1 %v2584_v55  ;;  %2601 = vmatprep.subr.bf16.mxu0 %v2789_v15 }
 0x229   :  { %2587 = vmatpush1.bf16.msra.mxu1 %v2586_v62  ;;  %2603 = vmatpush3.bf16.msra.mxu0 %v2602_v63 }
 0x22a   :  { %2589 = vmatprep.subr.bf16.mxu1 %v2588_v1  ;;  %2604 = vmatprep.subr.bf16.mxu0 %v2789_v15 }
 0x22d   :  { %2591 = vmatpush1.bf16.msra.mxu1 %v2590_v7  ;;  %2606 = vmatpush3.bf16.msra.mxu0 %v2605_v8 }
 0x22e   :  { %2212 = vmatprep.subr.msk.mxu1 %vm49_vm1, %v263_v9  ;;  %2380 = vmatprep.subr.mxu0 %v2791_v56 }
 0x231   :  { %2213 = vmatpush1.msk.msra.mxu1 %vm49_vm1, %v262_v12  ;;  %2381 = vmatpush3.msk.msra.mxu0 %vm49_vm1, %v264_v13 }
 0x232   :  { %2214 = vmatmul.mubr.msk.f32.vlgmr.msra.gmra.mrb[2].mxu1 %vm305_vm10, %v2884_v34  ;;  %2383 = vmatmul.mubr.msk.f32.vlgmr.msra.gmra.mrb[4].mxu0 %vm305_vm10, %v2884_v34 }
 0x233   :  { %2607 = vmatprep.subr.bf16.mxu1 %v2789_v15  ;;  %2391 = vmatprep.mubr.msk.f32.mxu1 %vm2790_vm5, %v2791_v56 }
 0x234   :  { %2609 = vmatpush3.bf16.msra.mxu1 %v2899_v14  ;;  %2616 = vmatprep.subr.bf16.mxu0 %v2789_v15 }
 0x235   :  { %2389 = vmatprep.subr.mxu1 %v2791_v56  ;;  %2618 = vmatpush3.bf16.msra.mxu0 %v2899_v14 }
 0x236   :  { %2416 = vmatprep.subr.mxu0 %v2791_v56  ;;  %2418 = vmatprep.mubr.msk.f32.mxu0 %vm2790_vm5, %v2791_v56 }
 0x238   :  { %2390 = vmatpush3.msk.msra.mxu1 %vm621_vm11, %v2913_v16 }
 0x239   :  { %2392 = vmatmul.mubr.f32.vlgmr.msra.gmra.mrb[4].mxu1 %v2791_v56  ;;  %2610 = vmatprep.subr.bf16.mxu1 %v2789_v15 }
 0x23a   :  { %2612 = vmatpush3.bf16.msra.mxu1 %v2899_v14  ;;  %2400 = vmatprep.mubr.msk.f32.mxu1 %vm2790_vm5, %v2791_v56 }
 0x23b   :  { %2398 = vmatprep.subr.mxu1 %v2791_v56  ;;  %2417 = vmatpush3.msk.msra.mxu0 %vm621_vm11, %v2913_v16 }
 0x23c   :  { %2622 = vmatprep.subr.bf16.mxu0 %v2789_v15 }
 0x23e   :  { %2399 = vmatpush3.msk.msra.mxu1 %vm621_vm11, %v2913_v16 }
 0x23f   :  { %2613 = vmatprep.subr.bf16.mxu1 %v2789_v15 }
 0x2ef   :  { %v396_v17 = vpop.f32.mrb[0].mxu1  ;;  %v2933_v18 = vpop.f32.mrb[2].mxu0 }
 0x2f0   :  { %v2935_v19 = vpop.f32.mrb[1].mxu1  ;;  %v2937_v2 = vpop.f32.mrb[3].mxu0  ;;  %v397_v33 = vadd.f32 %v396_v17, %v273_v32 }
 0x305   :  { %v2939_v20 = vpop.f32.mrb[2].mxu1  ;;  %v2941_v21 = vpop.f32.mrb[4].mxu0 }
 0x306   :  { %v2943_v22 = vpop.f32.mrb[3].mxu1  ;;  %v2384_v5 = vpop.f32.mrb[5].mxu0 }
 0x307   :  { %v276_v5 = vsub.s32 1, %v2860_v38 }
 0x30c   :  { %v691_v24 = vpop.f32.mrb[4].mxu1 }
 0x30d   :  { %v692_v25 = vadd.f32 %v691_v24, %v2945_v23  ;;  %v2393_v26 = vpop.f32.mrb[5].mxu1  ;;  %v277_v24 = vrot.slane %v2949_v30, %v276_v5 }
 0x30f   :  { %703 = vrot.lane.b32.xlu1 %v692_v25, %s2795_s7  ;;  %v695_v34 = vadd.f32 %v692_v25, %v397_v33  ;;  %v399_v25 = vadd.f32 %v2935_v19, %v277_v24 }
 0x311   :  { %v2218_v35 = vmul.f32 -1.442695, %v695_v34 }
 0x313   :  { %2678 = vpow2.f32 %v2218_v35 }
 0x31d   :  { %v2679_v36 = vpop.eup %2678 }
 0x31e   :  { %v699_v37 = vadd.f32 1.0, %v2679_v36 }
 0x320   :  { %2680 = vrcp.f32 %v699_v37 }
 0x32a   :  { %v2681_v39 = vpop.eup %2680 }
 0x32b   :  { %v713_v45 = vsub.f32 1.0, %v2681_v39  ;;  %v719_v47 = vmul.f32 0.0, %v2681_v39 }
 0x381   :  { %v704_v40 = vpop.permute.xlu1 %703 }
 0x382   :  { %v706_v41 = vmul.f32 %v2681_v39, %v704_v40 }
 0x384   :  { %708 = vrot.lane.b32.xlu0 %v706_v41, %s2796_s8 }
 0x3f6   :  { %v709_v42 = vpop.permute.xlu0 %708 }
 0x3f7   :  { %v711_v43 = vadd.f32 %v709_v42, %v397_v33 }
 0x3f9   :  { %2682 = vtanh.f32 %v711_v43 }
 0x403   :  { %v2683_v44 = vpop.eup %2682 }
 0x404   :  { %715 = vrot.lane.b32.xlu1 %v2683_v44, %s2797_s9 }
 0x476   :  { %v716_v46 = vpop.permute.xlu1 %715 }
 0x477   :  { %v718_v48 = vmul.f32 %v716_v46, %v713_v45 }
 0x479   :  { %v720_v49 = vadd.f32 %v719_v47, %v718_v48 }
 0x47b   :  { %722 = vrot.lane.b32.xlu0 %v720_v49, %s2797_s9 }
 0x4ed   :  { %v723_v50 = vpop.permute.xlu0 %722 }
 0x4ee   :  { %2401 = vmatmul.mubr.msk.f32.vlgmr.msra.gmra.mrb[6].mxu1 %vm617_vm12, %v723_v50 }
 0x4ef   :  { %2615 = vmatpush3.bf16.msra.mxu1 %v2899_v14  ;;  %2409 = vmatprep.mubr.msk.f32.mxu1 %vm2790_vm5, %v2791_v56 }
 0x4f0   :  { %2407 = vmatprep.subr.mxu1 %v2791_v56 }
 0x4f3   :  { %2408 = vmatpush3.msk.msra.mxu1 %vm621_vm11, %v2913_v16 }
 0x4f4   :  { %2619 = vmatprep.subr.bf16.mxu1 %v2789_v15 }
 0x5c1   :  { %v792_v51 = vpop.f32.mrb[6].mxu1 }
 0x5c2   :  { %v793_v53 = vadd.f32 %v792_v51, %v2945_v23  ;;  %v2402_v54 = vpop.f32.mrb[7].mxu1 }
 0x5c4   :  { %807 = vrot.lane.b32.xlu0 %v793_v53, %s2798_s10  ;;  %797 = vrot.lane.b32.xlu1 %v793_v53, %s2799_s11 }
 0x636   :  { %v798_v55 = vpop.permute.xlu1 %797  ;;  %v808_v62 = vpop.permute.xlu0 %807 }
 0x637   :  { %v800_v57 = vadd.f32 %v798_v55, %v397_v33 }
 0x639   :  { %v2221_v58 = vmul.f32 -1.442695, %v800_v57 }
 0x63b   :  { %2684 = vpow2.f32 %v2221_v58 }
 0x645   :  { %v2685_v59 = vpop.eup %2684 }
 0x646   :  { %v804_v60 = vadd.f32 1.0, %v2685_v59 }
 0x648   :  { %2686 = vrcp.f32 %v804_v60 }
 0x652   :  { %v2687_v61 = vpop.eup %2686 }
 0x653   :  { %v810_v63 = vmul.f32 %v2687_v61, %v808_v62  ;;  %v817_v6 = vsub.f32 1.0, %v2687_v61 }
 0x655   :  { %812 = vrot.lane.b32.xlu1 %v810_v63, %s2796_s8 }
 0x659   :  { %823 = vrot.lane.b32.xlu1 %v720_v49, %s2799_s11 }
 0x6c7   :  { %v813_v0 = vpop.permute.xlu1 %812 }
 0x6c8   :  { %v815_v1 = vadd.f32 %v813_v0, %v397_v33 }
 0x6ca   :  { %2688 = vtanh.f32 %v815_v1 }
 0x6cb   :  { %v824_v4 = vpop.permute.xlu1 %823 }
 0x6cc   :  { %v826_v8 = vmul.f32 %v2687_v61, %v824_v4 }
 0x6d4   :  { %v2689_v3 = vpop.eup %2688 }
 0x6d5   :  { %819 = vrot.lane.b32.xlu0 %v2689_v3, %s2797_s9 }
 0x747   :  { %v820_v7 = vpop.permute.xlu0 %819 }
 0x748   :  { %v822_v9 = vmul.f32 %v820_v7, %v817_v6 }
 0x74a   :  { %v827_v10 = vadd.f32 %v826_v8, %v822_v9  ;;  %v280_v9 = vsub.s32 2, %v2860_v38 }
 0x74c   :  { %829 = vrot.lane.b32.xlu0 %v827_v10, %s2800_s12 }
 0x7be   :  { %v830_v11 = vpop.permute.xlu0 %829 }
 0x7bf   :  { %2410 = vmatmul.mubr.msk.f32.vlgmr.msra.gmra.mrb[8].mxu1 %vm617_vm12, %v830_v11 }
 0x7c0   :  { %2621 = vmatpush3.bf16.msra.mxu1 %v2899_v14  ;;  %2427 = vmatprep.mubr.msk.f32.mxu1 %vm2790_vm5, %v2791_v56 }
 0x7c1   :  { %2425 = vmatprep.subr.mxu1 %v2791_v56 }
 0x7c4   :  { %2426 = vmatpush3.msk.msra.mxu1 %vm621_vm11, %v2913_v16 }
 0x7c5   :  { %2625 = vmatprep.subr.bf16.mxu1 %v2789_v15 }
 0x892   :  { %v899_v12 = vpop.f32.mrb[8].mxu1 }
 0x893   :  { %v900_v13 = vadd.f32 %v899_v12, %v2945_v23  ;;  %v2411_v17 = vpop.f32.mrb[9].mxu1 }
 0x895   :  { %911 = vrot.lane.b32.xlu1 %v900_v13, %s2795_s7  ;;  %v903_v26 = vadd.f32 %v900_v13, %v399_v25 }
 0x897   :  { %v2224_v27 = vmul.f32 -1.442695, %v903_v26 }
 0x899   :  { %2690 = vpow2.f32 %v2224_v27 }
 0x8a3   :  { %v2691_v28 = vpop.eup %2690 }
 0x8a4   :  { %v907_v31 = vadd.f32 1.0, %v2691_v28 }
 0x8a6   :  { %2692 = vrcp.f32 %v907_v31 }
 0x8b0   :  { %v2693_v32 = vpop.eup %2692 }
 0x8b1   :  { %v921_v39 = vsub.f32 1.0, %v2693_v32 }
 0x907   :  { %v912_v33 = vpop.permute.xlu1 %911 }
 0x908   :  { %v914_v34 = vmul.f32 %v2693_v32, %v912_v33 }
 0x90a   :  { %916 = vrot.lane.b32.xlu0 %v914_v34, %s2796_s8 }
 0x90e   :  { %927 = vrot.lane.b32.xlu0 %v827_v10, %s2799_s11  ;;  %v281_v10 = vrot.slane %v2949_v30, %v280_v9 }
 0x910   :  { %v468_v11 = vadd.f32 %v2933_v18, %v281_v10 }
 0x97c   :  { %v917_v35 = vpop.permute.xlu0 %916 }
 0x97d   :  { %v919_v36 = vadd.f32 %v917_v35, %v399_v25 }
 0x97f   :  { %2694 = vtanh.f32 %v919_v36 }
 0x980   :  { %v928_v19 = vpop.permute.xlu0 %927 }
 0x981   :  { %v930_v41 = vmul.f32 %v2693_v32, %v928_v19 }
 0x989   :  { %v2695_v37 = vpop.eup %2694 }
 0x98a   :  { %923 = vrot.lane.b32.xlu1 %v2695_v37, %s2797_s9 }
 0x9fc   :  { %v924_v40 = vpop.permute.xlu1 %923 }
 0x9fd   :  { %v926_v42 = vmul.f32 %v924_v40, %v921_v39 }
 0x9ff   :  { %v931_v43 = vadd.f32 %v930_v41, %v926_v42 }
 0xa01   :  { %933 = vrot.lane.b32.xlu1 %v931_v43, %s2797_s9 }
 0xa73   :  { %v934_v44 = vpop.permute.xlu1 %933 }
 0xa74   :  { %2419 = vmatmul.mubr.msk.f32.vlgmr.msra.gmra.mrb[6].mxu0 %vm617_vm12, %v934_v44 }
 0xa75   :  { %2624 = vmatpush3.bf16.msra.mxu0 %v2899_v14  ;;  %2436 = vmatprep.mubr.msk.f32.mxu0 %vm2790_vm5, %v2791_v56 }
 0xa76   :  { %2434 = vmatprep.subr.mxu0 %v2791_v56 }
 0xa79   :  { %2435 = vmatpush3.msk.msra.mxu0 %vm621_vm11, %v2913_v16 }
 0xa7a   :  { %2628 = vmatprep.subr.bf16.mxu0 %v2789_v15 }
 0xb47   :  { %v1003_v45 = vpop.f32.mrb[6].mxu0 }
 0xb48   :  { %v1004_v46 = vadd.f32 %v1003_v45, %v2945_v23  ;;  %v2420_v47 = vpop.f32.mrb[7].mxu0 }
 0xb4a   :  { %1018 = vrot.lane.b32.xlu1 %v1004_v46, %s2798_s10  ;;  %1008 = vrot.lane.b32.xlu0 %v1004_v46, %s2799_s11 }
 0xbbc   :  { %v1009_v48 = vpop.permute.xlu0 %1008  ;;  %v1019_v55 = vpop.permute.xlu1 %1018 }
 0xbbd   :  { %v1011_v49 = vadd.f32 %v1009_v48, %v399_v25 }
 0xbbf   :  { %v2227_v50 = vmul.f32 -1.442695, %v1011_v49 }
 0xbc1   :  { %2696 = vpow2.f32 %v2227_v50 }
 0xbcb   :  { %v2697_v51 = vpop.eup %2696 }
 0xbcc   :  { %v1015_v53 = vadd.f32 1.0, %v2697_v51 }
 0xbce   :  { %2698 = vrcp.f32 %v1015_v53 }
 0xbd8   :  { %v2699_v54 = vpop.eup %2698 }
 0xbd9   :  { %v1021_v57 = vmul.f32 %v2699_v54, %v1019_v55  ;;  %v1028_v62 = vsub.f32 1.0, %v2699_v54 }
 0xbdb   :  { %1023 = vrot.lane.b32.xlu0 %v1021_v57, %s2796_s8 }
 0xbdf   :  { %1034 = vrot.lane.b32.xlu0 %v931_v43, %s2799_s11 }
 0xc4d   :  { %v1024_v58 = vpop.permute.xlu0 %1023 }
 0xc4e   :  { %v1026_v59 = vadd.f32 %v1024_v58, %v399_v25 }
 0xc50   :  { %2700 = vtanh.f32 %v1026_v59 }
 0xc51   :  { %v1035_v61 = vpop.permute.xlu0 %1034 }
 0xc52   :  { %v1037_v0 = vmul.f32 %v2699_v54, %v1035_v61 }
 0xc5a   :  { %v2701_v60 = vpop.eup %2700 }
 0xc5b   :  { %1030 = vrot.lane.b32.xlu1 %v2701_v60, %s2797_s9 }
 0xccd   :  { %v1031_v63 = vpop.permute.xlu1 %1030 }
 0xcce   :  { %v1033_v1 = vmul.f32 %v1031_v63, %v1028_v62 }
 0xcd0   :  { %v1038_v3 = vadd.f32 %v1037_v0, %v1033_v1  ;;  %v284_v0 = vsub.s32 3, %v2860_v38 }
 0xcd2   :  { %1040 = vrot.lane.b32.xlu1 %v1038_v3, %s2800_s12  ;;  %v285_v1 = vrot.slane %v2949_v30, %v284_v0 }
 0xd44   :  { %v1041_v4 = vpop.permute.xlu1 %1040 }
 0xd45   :  { %2428 = vmatmul.mubr.msk.f32.vlgmr.msra.gmra.mrb[10].mxu1 %vm617_vm12, %v1041_v4 }
 0xd46   :  { %2627 = vmatpush3.bf16.msra.mxu1 %v2899_v14  ;;  %2445 = vmatprep.mubr.msk.f32.mxu1 %vm2790_vm5, %v2791_v56 }
 0xd47   :  { %2443 = vmatprep.subr.mxu1 %v2791_v56 }
 0xd4a   :  { %2444 = vmatpush3.msk.msra.mxu1 %vm621_vm11, %v2913_v16 }
 0xd4b   :  { %2631 = vmatprep.subr.bf16.mxu1 %v2789_v15 }
 0xe18   :  { %v1110_v6 = vpop.f32.mrb[10].mxu1 }
 0xe19   :  { %v1111_v7 = vadd.f32 %v1110_v6, %v2945_v23  ;;  %v2429_v8 = vpop.f32.mrb[11].mxu1 }
 0xe1b   :  { %1122 = vrot.lane.b32.xlu0 %v1111_v7, %s2795_s7  ;;  %v1114_v12 = vadd.f32 %v1111_v7, %v468_v11 }
 0xe1d   :  { %v2230_v13 = vmul.f32 -1.442695, %v1114_v12 }
 0xe1f   :  { %2702 = vpow2.f32 %v2230_v13 }
 0xe29   :  { %v2703_v17 = vpop.eup %2702 }
 0xe2a   :  { %v1118_v5 = vadd.f32 1.0, %v2703_v17 }
 0xe2c   :  { %2704 = vrcp.f32 %v1118_v5 }
 0xe36   :  { %v2705_v24 = vpop.eup %2704 }
 0xe37   :  { %v1132_v32 = vsub.f32 1.0, %v2705_v24 }
 0xe8d   :  { %v1123_v25 = vpop.permute.xlu0 %1122 }
 0xe8e   :  { %v1125_v26 = vmul.f32 %v2705_v24, %v1123_v25 }
 0xe90   :  { %1127 = vrot.lane.b32.xlu1 %v1125_v26, %s2796_s8 }
 0xe94   :  { %1138 = vrot.lane.b32.xlu1 %v1038_v3, %s2799_s11  ;;  %v470_v3 = vadd.f32 %v2937_v2, %v285_v1 }
 0xf02   :  { %v1128_v27 = vpop.permute.xlu1 %1127 }
 0xf03   :  { %v1130_v28 = vadd.f32 %v1128_v27, %v468_v11 }
 0xf05   :  { %2706 = vtanh.f32 %v1130_v28 }
 0xf06   :  { %v1139_v18 = vpop.permute.xlu1 %1138 }
 0xf07   :  { %v1141_v34 = vmul.f32 %v2705_v24, %v1139_v18 }
 0xf0f   :  { %v2707_v31 = vpop.eup %2706 }
 0xf10   :  { %1134 = vrot.lane.b32.xlu0 %v2707_v31, %s2797_s9 }
 0xf82   :  { %v1135_v33 = vpop.permute.xlu0 %1134 }
 0xf83   :  { %v1137_v35 = vmul.f32 %v1135_v33, %v1132_v32 }
 0xf85   :  { %v1142_v36 = vadd.f32 %v1141_v34, %v1137_v35 }
 0xf87   :  { %1144 = vrot.lane.b32.xlu0 %v1142_v36, %s2797_s9 }
 0xff9   :  { %v1145_v37 = vpop.permute.xlu0 %1144 }
 0xffa   :  { %2437 = vmatmul.mubr.msk.f32.vlgmr.msra.gmra.mrb[8].mxu0 %vm617_vm12, %v1145_v37 }
 0xffb   :  { %2630 = vmatpush3.bf16.msra.mxu0 %v2899_v14  ;;  %2454 = vmatprep.mubr.msk.f32.mxu0 %vm2790_vm5, %v2791_v56 }
 0xffc   :  { %2452 = vmatprep.subr.mxu0 %v2791_v56 }
 0xfff   :  { %2453 = vmatpush3.msk.msra.mxu0 %vm621_vm11, %v2913_v16 }
0x1000   :  { %2634 = vmatprep.subr.bf16.mxu0 %v2789_v15 }
0x10cd   :  { %v1214_v19 = vpop.f32.mrb[8].mxu0 }
0x10ce   :  { %v1215_v39 = vadd.f32 %v1214_v19, %v2945_v23  ;;  %v2438_v40 = vpop.f32.mrb[9].mxu0 }
0x10d0   :  { %1229 = vrot.lane.b32.xlu0 %v1215_v39, %s2798_s10  ;;  %1219 = vrot.lane.b32.xlu1 %v1215_v39, %s2799_s11 }
0x1142   :  { %v1220_v41 = vpop.permute.xlu1 %1219  ;;  %v1230_v47 = vpop.permute.xlu0 %1229 }
0x1143   :  { %v1222_v42 = vadd.f32 %v1220_v41, %v468_v11 }
0x1145   :  { %v2233_v43 = vmul.f32 -1.442695, %v1222_v42 }
0x1147   :  { %2708 = vpow2.f32 %v2233_v43 }
0x1151   :  { %v2709_v44 = vpop.eup %2708 }
0x1152   :  { %v1226_v45 = vadd.f32 1.0, %v2709_v44 }
0x1154   :  { %2710 = vrcp.f32 %v1226_v45 }
0x115e   :  { %v2711_v46 = vpop.eup %2710 }
0x115f   :  { %v1232_v48 = vmul.f32 %v2711_v46, %v1230_v47  ;;  %v1239_v54 = vsub.f32 1.0, %v2711_v46 }
0x1161   :  { %1234 = vrot.lane.b32.xlu1 %v1232_v48, %s2796_s8 }
0x1165   :  { %1245 = vrot.lane.b32.xlu1 %v1142_v36, %s2799_s11 }
0x11d3   :  { %v1235_v49 = vpop.permute.xlu1 %1234 }
0x11d4   :  { %v1237_v50 = vadd.f32 %v1235_v49, %v468_v11 }
0x11d6   :  { %2712 = vtanh.f32 %v1237_v50 }
0x11d7   :  { %v1246_v53 = vpop.permute.xlu1 %1245 }
0x11d8   :  { %v1248_v57 = vmul.f32 %v2711_v46, %v1246_v53 }
0x11e0   :  { %v2713_v51 = vpop.eup %2712 }
0x11e1   :  { %1241 = vrot.lane.b32.xlu0 %v2713_v51, %s2797_s9 }
0x1253   :  { %v1242_v55 = vpop.permute.xlu0 %1241 }
0x1254   :  { %v1244_v58 = vmul.f32 %v1242_v55, %v1239_v54  ;;  %v288_v55 = vsub.s32 4, %v2860_v38 }
0x1256   :  { %v1249_v59 = vadd.f32 %v1248_v57, %v1244_v58  ;;  %v289_v57 = vrot.slane %v2949_v30, %v288_v55 }
0x1258   :  { %1251 = vrot.lane.b32.xlu0 %v1249_v59, %s2800_s12  ;;  %v539_v58 = vadd.f32 %v2939_v20, %v289_v57 }
0x12ca   :  { %v1252_v60 = vpop.permute.xlu0 %1251 }
0x12cb   :  { %2446 = vmatmul.mubr.msk.f32.vlgmr.msra.gmra.mrb[12].mxu1 %vm617_vm12, %v1252_v60 }
0x12cc   :  { %2633 = vmatpush3.bf16.msra.mxu1 %v2899_v14  ;;  %2463 = vmatprep.mubr.msk.f32.mxu1 %vm2790_vm5, %v2791_v56 }
0x12cd   :  { %2461 = vmatprep.subr.mxu1 %v2791_v56 }
0x12d0   :  { %2462 = vmatpush3.msk.msra.mxu1 %vm621_vm11, %v2913_v16 }
0x12d1   :  { %2637 = vmatprep.subr.bf16.mxu1 %v2789_v15 }
0x139e   :  { %v1321_v61 = vpop.f32.mrb[12].mxu1 }
0x139f   :  { %v1322_v62 = vadd.f32 %v1321_v61, %v2945_v23  ;;  %v2447_v63 = vpop.f32.mrb[13].mxu1 }
0x13a1   :  { %1333 = vrot.lane.b32.xlu1 %v1322_v62, %s2795_s7  ;;  %v1325_v4 = vadd.f32 %v1322_v62, %v470_v3 }
0x13a3   :  { %v2236_v6 = vmul.f32 -1.442695, %v1325_v4 }
0x13a5   :  { %2714 = vpow2.f32 %v2236_v6 }
0x13af   :  { %v2715_v7 = vpop.eup %2714 }
0x13b0   :  { %v1329_v8 = vadd.f32 1.0, %v2715_v7 }
0x13b2   :  { %2716 = vrcp.f32 %v1329_v8 }
0x13bc   :  { %v2717_v9 = vpop.eup %2716 }
0x13bd   :  { %v1343_v5 = vsub.f32 1.0, %v2717_v9 }
0x1413   :  { %v1334_v10 = vpop.permute.xlu1 %1333 }
0x1414   :  { %v1336_v11 = vmul.f32 %v2717_v9, %v1334_v10 }
0x1416   :  { %1338 = vrot.lane.b32.xlu0 %v1336_v11, %s2796_s8 }
0x141a   :  { %1349 = vrot.lane.b32.xlu0 %v1249_v59, %s2799_s11 }
0x1488   :  { %v1339_v12 = vpop.permute.xlu0 %1338 }
0x1489   :  { %v1341_v13 = vadd.f32 %v1339_v12, %v470_v3 }
0x148b   :  { %2718 = vtanh.f32 %v1341_v13 }
0x148c   :  { %v1350_v2 = vpop.permute.xlu0 %1349 }
0x148d   :  { %v1352_v25 = vmul.f32 %v2717_v9, %v1350_v2 }
0x1495   :  { %v2719_v17 = vpop.eup %2718 }
0x1496   :  { %1345 = vrot.lane.b32.xlu1 %v2719_v17, %s2797_s9 }
0x1508   :  { %v1346_v24 = vpop.permute.xlu1 %1345 }
0x1509   :  { %v1348_v26 = vmul.f32 %v1346_v24, %v1343_v5 }
0x150b   :  { %v1353_v27 = vadd.f32 %v1352_v25, %v1348_v26 }
0x150d   :  { %1355 = vrot.lane.b32.xlu1 %v1353_v27, %s2797_s9 }
0x157f   :  { %v1356_v28 = vpop.permute.xlu1 %1355 }
0x1580   :  { %2455 = vmatmul.mubr.msk.f32.vlgmr.msra.gmra.mrb[10].mxu0 %vm617_vm12, %v1356_v28 }
0x1581   :  { %2636 = vmatpush3.bf16.msra.mxu0 %v2899_v14  ;;  %2472 = vmatprep.mubr.msk.f32.mxu0 %vm2790_vm5, %v2791_v56 }
0x1582   :  { %2470 = vmatprep.subr.mxu0 %v2791_v56 }
0x1585   :  { %2471 = vmatpush3.msk.msra.mxu0 %vm621_vm11, %v2913_v16 }
0x1586   :  { %2640 = vmatprep.subr.bf16.mxu0 %v2789_v15 }
0x1653   :  { %v1425_v31 = vpop.f32.mrb[10].mxu0 }
0x1654   :  { %v1426_v18 = vadd.f32 %v1425_v31, %v2945_v23  ;;  %v2456_v32 = vpop.f32.mrb[11].mxu0 }
0x1656   :  { %1440 = vrot.lane.b32.xlu1 %v1426_v18, %s2798_s10  ;;  %1430 = vrot.lane.b32.xlu0 %v1426_v18, %s2799_s11 }
0x16c8   :  { %v1431_v33 = vpop.permute.xlu0 %1430  ;;  %v1441_v39 = vpop.permute.xlu1 %1440 }
0x16c9   :  { %v1433_v34 = vadd.f32 %v1431_v33, %v470_v3 }
0x16cb   :  { %v2239_v35 = vmul.f32 -1.442695, %v1433_v34 }
0x16cd   :  { %2720 = vpow2.f32 %v2239_v35 }
0x16d7   :  { %v2721_v36 = vpop.eup %2720 }
0x16d8   :  { %v1437_v37 = vadd.f32 1.0, %v2721_v36 }
0x16da   :  { %2722 = vrcp.f32 %v1437_v37 }
0x16e4   :  { %v2723_v19 = vpop.eup %2722 }
0x16e5   :  { %v1443_v40 = vmul.f32 %v2723_v19, %v1441_v39  ;;  %v1450_v45 = vsub.f32 1.0, %v2723_v19 }
0x16e7   :  { %1445 = vrot.lane.b32.xlu0 %v1443_v40, %s2796_s8 }
0x16eb   :  { %1456 = vrot.lane.b32.xlu0 %v1353_v27, %s2799_s11 }
0x1759   :  { %v1446_v41 = vpop.permute.xlu0 %1445 }
0x175a   :  { %v1448_v42 = vadd.f32 %v1446_v41, %v470_v3 }
0x175c   :  { %2724 = vtanh.f32 %v1448_v42 }
0x175d   :  { %v1457_v44 = vpop.permute.xlu0 %1456 }
0x175e   :  { %v1459_v47 = vmul.f32 %v2723_v19, %v1457_v44 }
0x1766   :  { %v2725_v43 = vpop.eup %2724 }
0x1767   :  { %1452 = vrot.lane.b32.xlu1 %v2725_v43, %s2797_s9 }
0x17d9   :  { %v1453_v46 = vpop.permute.xlu1 %1452 }
0x17da   :  { %v1455_v48 = vmul.f32 %v1453_v46, %v1450_v45  ;;  %v292_v45 = vsub.s32 5, %v2860_v38 }
0x17dc   :  { %v1460_v49 = vadd.f32 %v1459_v47, %v1455_v48  ;;  %v293_v46 = vrot.slane %v2949_v30, %v292_v45 }
0x17de   :  { %1462 = vrot.lane.b32.xlu1 %v1460_v49, %s2800_s12  ;;  %v541_v47 = vadd.f32 %v2943_v22, %v293_v46 }
0x1850   :  { %v1463_v50 = vpop.permute.xlu1 %1462 }
0x1851   :  { %2464 = vmatmul.mubr.msk.f32.vlgmr.msra.gmra.mrb[14].mxu1 %vm617_vm12, %v1463_v50 }
0x1852   :  { %2639 = vmatpush3.bf16.msra.mxu1 %v2899_v14  ;;  %2481 = vmatprep.mubr.msk.f32.mxu1 %vm2790_vm5, %v2791_v56 }
0x1853   :  { %2479 = vmatprep.subr.mxu1 %v2791_v56 }
0x1856   :  { %2480 = vmatpush3.msk.msra.mxu1 %vm621_vm11, %v2913_v16 }
0x1857   :  { %2643 = vmatprep.subr.bf16.mxu1 %v2789_v15 }
0x1924   :  { %v1532_v51 = vpop.f32.mrb[14].mxu1 }
0x1925   :  { %v1533_v53 = vadd.f32 %v1532_v51, %v2945_v23  ;;  %v2465_v54 = vpop.f32.mrb[15].mxu1 }
0x1927   :  { %1544 = vrot.lane.b32.xlu0 %v1533_v53, %s2795_s7  ;;  %v1536_v59 = vadd.f32 %v1533_v53, %v539_v58 }
0x1929   :  { %v2242_v60 = vmul.f32 -1.442695, %v1536_v59 }
0x192b   :  { %2726 = vpow2.f32 %v2242_v60 }
0x1935   :  { %v2727_v61 = vpop.eup %2726 }
0x1936   :  { %v1540_v62 = vadd.f32 1.0, %v2727_v61 }
0x1938   :  { %2728 = vrcp.f32 %v1540_v62 }
0x1942   :  { %v2729_v63 = vpop.eup %2728 }
0x1943   :  { %v1554_v7 = vsub.f32 1.0, %v2729_v63 }
0x1999   :  { %v1545_v0 = vpop.permute.xlu0 %1544 }
0x199a   :  { %v1547_v1 = vmul.f32 %v2729_v63, %v1545_v0 }
0x199c   :  { %1549 = vrot.lane.b32.xlu1 %v1547_v1, %s2796_s8 }
0x19a0   :  { %1560 = vrot.lane.b32.xlu1 %v1460_v49, %s2799_s11 }
0x1a0e   :  { %v1550_v3 = vpop.permute.xlu1 %1549 }
0x1a0f   :  { %v1552_v4 = vadd.f32 %v1550_v3, %v539_v58 }
0x1a11   :  { %2730 = vtanh.f32 %v1552_v4 }
0x1a12   :  { %v1561_v20 = vpop.permute.xlu1 %1560 }
0x1a13   :  { %v1563_v9 = vmul.f32 %v2729_v63, %v1561_v20 }
0x1a1b   :  { %v2731_v6 = vpop.eup %2730 }
0x1a1c   :  { %1556 = vrot.lane.b32.xlu0 %v2731_v6, %s2797_s9 }
0x1a8e   :  { %v1557_v8 = vpop.permute.xlu0 %1556 }
0x1a8f   :  { %v1559_v10 = vmul.f32 %v1557_v8, %v1554_v7 }
0x1a91   :  { %v1564_v11 = vadd.f32 %v1563_v9, %v1559_v10 }
0x1a93   :  { %1566 = vrot.lane.b32.xlu0 %v1564_v11, %s2797_s9 }
0x1b05   :  { %v1567_v12 = vpop.permute.xlu0 %1566 }
0x1b06   :  { %2473 = vmatmul.mubr.msk.f32.vlgmr.msra.gmra.mrb[12].mxu0 %vm617_vm12, %v1567_v12 }
0x1b07   :  { %2642 = vmatpush3.bf16.msra.mxu0 %v2899_v14  ;;  %2490 = vmatprep.mubr.msk.f32.mxu0 %vm2790_vm5, %v2791_v56 }
0x1b08   :  { %2488 = vmatprep.subr.mxu0 %v2791_v56 }
0x1b0b   :  { %2489 = vmatpush3.msk.msra.mxu0 %vm621_vm11, %v2913_v16 }
0x1b0c   :  { %2646 = vmatprep.subr.bf16.mxu0 %v2789_v15 }
0x1bd9   :  { %v1636_v13 = vpop.f32.mrb[12].mxu0 }
0x1bda   :  { %v1637_v17 = vadd.f32 %v1636_v13, %v2945_v23  ;;  %v2474_v2 = vpop.f32.mrb[13].mxu0 }
0x1bdc   :  { %1651 = vrot.lane.b32.xlu0 %v1637_v17, %s2798_s10  ;;  %1641 = vrot.lane.b32.xlu1 %v1637_v17, %s2799_s11 }
0x1c4e   :  { %v1642_v5 = vpop.permute.xlu1 %1641  ;;  %v1652_v31 = vpop.permute.xlu0 %1651 }
0x1c4f   :  { %v1644_v24 = vadd.f32 %v1642_v5, %v539_v58 }
0x1c51   :  { %v2245_v25 = vmul.f32 -1.442695, %v1644_v24 }
0x1c53   :  { %2732 = vpow2.f32 %v2245_v25 }
0x1c5d   :  { %v2733_v26 = vpop.eup %2732 }
0x1c5e   :  { %v1648_v27 = vadd.f32 1.0, %v2733_v26 }
0x1c60   :  { %2734 = vrcp.f32 %v1648_v27 }
0x1c6a   :  { %v2735_v28 = vpop.eup %2734 }
0x1c6b   :  { %v1654_v18 = vmul.f32 %v2735_v28, %v1652_v31  ;;  %v1661_v36 = vsub.f32 1.0, %v2735_v28 }
0x1c6d   :  { %1656 = vrot.lane.b32.xlu1 %v1654_v18, %s2796_s8 }
0x1c71   :  { %1667 = vrot.lane.b32.xlu1 %v1564_v11, %s2799_s11 }
0x1cdf   :  { %v1657_v32 = vpop.permute.xlu1 %1656 }
0x1ce0   :  { %v1659_v33 = vadd.f32 %v1657_v32, %v539_v58  ;;  %v296_v32 = vsub.s32 6, %v2860_v38 }
0x1ce2   :  { %2736 = vtanh.f32 %v1659_v33  ;;  %v297_v33 = vrot.slane %v2949_v30, %v296_v32 }
0x1ce3   :  { %v1668_v35 = vpop.permute.xlu1 %1667 }
0x1ce4   :  { %v1670_v19 = vmul.f32 %v2735_v28, %v1668_v35 }
0x1cec   :  { %v2737_v34 = vpop.eup %2736 }
0x1ced   :  { %1663 = vrot.lane.b32.xlu0 %v2737_v34, %s2797_s9  ;;  %v610_v34 = vadd.f32 %v2941_v21, %v297_v33 }
0x1d5f   :  { %v1664_v37 = vpop.permute.xlu0 %1663 }
0x1d60   :  { %v1666_v39 = vmul.f32 %v1664_v37, %v1661_v36 }
0x1d62   :  { %v1671_v40 = vadd.f32 %v1670_v19, %v1666_v39 }
0x1d64   :  { %1673 = vrot.lane.b32.xlu0 %v1671_v40, %s2800_s12 }
0x1dd6   :  { %v1674_v41 = vpop.permute.xlu0 %1673 }
0x1dd7   :  { %2482 = vmatmul.mubr.msk.f32.vlgmr.msra.gmra.mrb[16].mxu1 %vm617_vm12, %v1674_v41 }
0x1dd8   :  { %2645 = vmatpush3.bf16.msra.mxu1 %v2899_v14  ;;  %2499 = vmatprep.mubr.msk.f32.mxu1 %vm2790_vm5, %v2791_v56 }
0x1dd9   :  { %2497 = vmatprep.subr.mxu1 %v2791_v56 }
0x1ddc   :  { %2498 = vmatpush3.msk.msra.mxu1 %vm621_vm11, %v2913_v16 }
0x1ddd   :  { %2649 = vmatprep.subr.bf16.mxu1 %v2789_v15 }
0x1eaa   :  { %v1743_v42 = vpop.f32.mrb[16].mxu1 }
0x1eab   :  { %v1744_v43 = vadd.f32 %v1743_v42, %v2945_v23  ;;  %v2483_v44 = vpop.f32.mrb[17].mxu1 }
0x1ead   :  { %1755 = vrot.lane.b32.xlu1 %v1744_v43, %s2795_s7  ;;  %v1747_v48 = vadd.f32 %v1744_v43, %v541_v47 }
0x1eaf   :  { %v2248_v49 = vmul.f32 -1.442695, %v1747_v48 }
0x1eb1   :  { %2738 = vpow2.f32 %v2248_v49 }
0x1ebb   :  { %v2739_v50 = vpop.eup %2738 }
0x1ebc   :  { %v1751_v51 = vadd.f32 1.0, %v2739_v50 }
0x1ebe   :  { %2740 = vrcp.f32 %v1751_v51 }
0x1ec8   :  { %v2741_v53 = vpop.eup %2740 }
0x1ec9   :  { %v1765_v59 = vsub.f32 1.0, %v2741_v53 }
0x1f1f   :  { %v1756_v15 = vpop.permute.xlu1 %1755 }
0x1f20   :  { %v1758_v54 = vmul.f32 %v2741_v53, %v1756_v15 }
0x1f22   :  { %1760 = vrot.lane.b32.xlu0 %v1758_v54, %s2796_s8 }
0x1f26   :  { %1771 = vrot.lane.b32.xlu0 %v1671_v40, %s2799_s11 }
0x1f94   :  { %v1761_v55 = vpop.permute.xlu0 %1760 }
0x1f95   :  { %v1763_v57 = vadd.f32 %v1761_v55, %v541_v47 }
0x1f97   :  { %2742 = vtanh.f32 %v1763_v57 }
0x1f98   :  { %v1772_v22 = vpop.permute.xlu0 %1771 }
0x1f99   :  { %v1774_v61 = vmul.f32 %v2741_v53, %v1772_v22 }
0x1fa1   :  { %v2743_v58 = vpop.eup %2742 }
0x1fa2   :  { %1767 = vrot.lane.b32.xlu1 %v2743_v58, %s2797_s9 }
0x2014   :  { %v1768_v60 = vpop.permute.xlu1 %1767 }
0x2015   :  { %v1770_v62 = vmul.f32 %v1768_v60, %v1765_v59 }
0x2017   :  { %v1775_v63 = vadd.f32 %v1774_v61, %v1770_v62  ;;  %v2094_v61 = vld [vmem:[#allocation2 + $0x4d0] sm:$0xff]  ;;  %v2095_v62 = vld [vmem:[#allocation2 + $0x508] sm:$0xff] }
0x2019   :  { %1777 = vrot.lane.b32.xlu1 %v1775_v63, %s2797_s9 }
0x208b   :  { %v1778_v0 = vpop.permute.xlu1 %1777 }
0x208c   :  { %2491 = vmatmul.mubr.msk.f32.vlgmr.msra.gmra.mrb[14].mxu0 %vm617_vm12, %v1778_v0  ;;  %v2096_v0 = vld [vmem:[#allocation2 + $0x540] sm:$0x3] }
0x208d   :  { %2648 = vmatpush3.bf16.msra.mxu0 %v2899_v14  ;;  %2508 = vmatprep.mubr.msk.f32.mxu0 %vm2790_vm5, %v2791_v56 }
0x208e   :  { %2506 = vmatprep.subr.mxu0 %v2791_v56 }
0x2091   :  { %2507 = vmatpush3.msk.msra.mxu0 %vm621_vm11, %v2913_v16 }
0x215f   :  { %v1847_v1 = vpop.f32.mrb[14].mxu0 }
0x2160   :  { %v1848_v3 = vadd.f32 %v1847_v1, %v2945_v23  ;;  %v2492_v4 = vpop.f32.mrb[15].mxu0 }
0x2162   :  { %1862 = vrot.lane.b32.xlu1 %v1848_v3, %s2798_s10  ;;  %1852 = vrot.lane.b32.xlu0 %v1848_v3, %s2799_s11 }
0x21d4   :  { %v1853_v6 = vpop.permute.xlu0 %1852  ;;  %v1863_v10 = vpop.permute.xlu1 %1862 }
0x21d5   :  { %v1855_v20 = vadd.f32 %v1853_v6, %v541_v47 }
0x21d7   :  { %v2251_v7 = vmul.f32 -1.442695, %v1855_v20 }
0x21d9   :  { %2744 = vpow2.f32 %v2251_v7 }
0x21e3   :  { %v2745_v14 = vpop.eup %2744 }
0x21e4   :  { %v1859_v8 = vadd.f32 1.0, %v2745_v14 }
0x21e6   :  { %2746 = vrcp.f32 %v1859_v8  ;;  %v2097_v8 = vld [vmem:[#allocation2 + $0x57b] ss:$0 sm:$0xff] }
0x21f0   :  { %v2747_v9 = vpop.eup %2746 }
0x21f1   :  { %v1865_v11 = vmul.f32 %v2747_v9, %v1863_v10  ;;  %v1872_v2 = vsub.f32 1.0, %v2747_v9 }
0x21f3   :  { %1867 = vrot.lane.b32.xlu0 %v1865_v11, %s2796_s8 }
0x21f7   :  { %1878 = vrot.lane.b32.xlu0 %v1775_v63, %s2799_s11  ;;  %v2650_v63 = vpack.c.bf16 %v2095_v62, %v2094_v61 }
0x2265   :  { %v1868_v16 = vpop.permute.xlu0 %1867 }
0x2266   :  { %v1870_v12 = vadd.f32 %v1868_v16, %v541_v47 }
0x2268   :  { %2748 = vtanh.f32 %v1870_v12 }
0x2269   :  { %v1879_v17 = vpop.permute.xlu0 %1878 }
0x226a   :  { %v1881_v24 = vmul.f32 %v2747_v9, %v1879_v17 }
0x2272   :  { %v2749_v13 = vpop.eup %2748 }
0x2273   :  { %1874 = vrot.lane.b32.xlu1 %v2749_v13, %s2797_s9 }
0x22e5   :  { %v1875_v5 = vpop.permute.xlu1 %1874 }
0x22e6   :  { %v1877_v25 = vmul.f32 %v1875_v5, %v1872_v2 }
0x22e8   :  { %v1882_v26 = vadd.f32 %v1881_v24, %v1877_v25 }
0x22ea   :  { %1884 = vrot.lane.b32.xlu1 %v1882_v26, %s2800_s12 }
0x235c   :  { %v1885_v27 = vpop.permute.xlu1 %1884 }
0x235d   :  { %2500 = vmatmul.mubr.msk.f32.vlgmr.msra.gmra.mrb[18].mxu1 %vm617_vm12, %v1885_v27 }
0x235e   :  { %2517 = vmatprep.mubr.msk.f32.mxu1 %vm2790_vm5, %v2791_v56  ;;  %2651 = vmatpush3.bf16.msra.mxu1 %v2650_v63 }
0x235f   :  { %2515 = vmatprep.subr.mxu1 %v2791_v56 }
0x2362   :  { %2516 = vmatpush3.msk.msra.mxu1 %vm621_vm11, %v2096_v0 }
0x2430   :  { %v1954_v28 = vpop.f32.mrb[18].mxu1 }
0x2431   :  { %v1955_v31 = vadd.f32 %v1954_v28, %v2945_v23  ;;  %v2501_v18 = vpop.f32.mrb[19].mxu1 }
0x2433   :  { %1966 = vrot.lane.b32.xlu0 %v1955_v31, %s2795_s7  ;;  %v1958_v35 = vadd.f32 %v1955_v31, %v610_v34 }
0x2435   :  { %v2254_v36 = vmul.f32 -1.442695, %v1958_v35 }
0x2437   :  { %2750 = vpow2.f32 %v2254_v36 }
0x2441   :  { %v2751_v37 = vpop.eup %2750 }
0x2442   :  { %v1962_v19 = vadd.f32 1.0, %v2751_v37 }
0x2444   :  { %2752 = vrcp.f32 %v1962_v19 }
0x244e   :  { %v2753_v39 = vpop.eup %2752 }
0x244f   :  { %v1976_v30 = vsub.f32 1.0, %v2753_v39 }
0x24a5   :  { %v1967_v40 = vpop.permute.xlu0 %1966 }
0x24a6   :  { %v1969_v41 = vmul.f32 %v2753_v39, %v1967_v40 }
0x24a8   :  { %1971 = vrot.lane.b32.xlu1 %v1969_v41, %s2796_s8 }
0x24ac   :  { %1982 = vrot.lane.b32.xlu1 %v1882_v26, %s2799_s11 }
0x251a   :  { %v1972_v42 = vpop.permute.xlu1 %1971 }
0x251b   :  { %v1974_v43 = vadd.f32 %v1972_v42, %v610_v34 }
0x251d   :  { %2754 = vtanh.f32 %v1974_v43 }
0x251e   :  { %v1983_v21 = vpop.permute.xlu1 %1982 }
0x251f   :  { %v1985_v45 = vmul.f32 %v2753_v39, %v1983_v21 }
0x2527   :  { %v2755_v38 = vpop.eup %2754 }
0x2528   :  { %1978 = vrot.lane.b32.xlu0 %v2755_v38, %s2797_s9 }
0x259a   :  { %v1979_v44 = vpop.permute.xlu0 %1978 }
0x259b   :  { %v1981_v46 = vmul.f32 %v1979_v44, %v1976_v30 }
0x259d   :  { %v1986_v47 = vadd.f32 %v1985_v45, %v1981_v46 }
0x259f   :  { %1988 = vrot.lane.b32.xlu0 %v1986_v47, %s2797_s9 }
0x2611   :  { %v1989_v48 = vpop.permute.xlu0 %1988 }
0x2612   :  { %2509 = vmatmul.mubr.msk.f32.vlgmr.msra.gmra.mrb[16].mxu0 %vm617_vm12, %v1989_v48 }
0x26e5   :  { %v2058_v49 = vpop.f32.mrb[16].mxu0 }
0x26e6   :  { %v2059_v50 = vadd.f32 %v2058_v49, %v2945_v23  ;;  %v2510_v51 = vpop.f32.mrb[17].mxu0 }
0x26e8   :  { %2073 = vrot.lane.b32.xlu0 %v2059_v50, %s2798_s10  ;;  %2063 = vrot.lane.b32.xlu1 %v2059_v50, %s2799_s11 }
0x275a   :  { %v2064_v53 = vpop.permute.xlu1 %2063  ;;  %v2074_v22 = vpop.permute.xlu0 %2073 }
0x275b   :  { %v2066_v15 = vadd.f32 %v2064_v53, %v610_v34 }
0x275d   :  { %v2257_v54 = vmul.f32 -1.442695, %v2066_v15 }
0x275f   :  { %2756 = vpow2.f32 %v2257_v54 }
0x2769   :  { %v2757_v55 = vpop.eup %2756 }
0x276a   :  { %v2070_v57 = vadd.f32 1.0, %v2757_v55 }
0x276c   :  { %2758 = vrcp.f32 %v2070_v57 }
0x2776   :  { %v2759_v58 = vpop.eup %2758 }
0x2777   :  { %v2076_v59 = vmul.f32 %v2759_v58, %v2074_v22  ;;  %v2083_v4 = vsub.f32 1.0, %v2759_v58 }
0x2779   :  { %2078 = vrot.lane.b32.xlu1 %v2076_v59, %s2796_s8 }
0x277d   :  { %2089 = vrot.lane.b32.xlu1 %v1986_v47, %s2799_s11 }
0x2781   :  { %2177 = vrot.lane.b32.xlu1 %v2881_v29, %s2801_s13 }
0x27eb   :  { %v2079_v23 = vpop.permute.xlu1 %2078 }
0x27ec   :  { %v2081_v60 = vadd.f32 %v2079_v23, %v610_v34 }
0x27ee   :  { %2760 = vtanh.f32 %v2081_v60 }
0x27ef   :  { %v2090_v3 = vpop.permute.xlu1 %2089 }
0x27f0   :  { %v2092_v20 = vmul.f32 %v2759_v58, %v2090_v3 }
0x27f3   :  { %v2178_v11 = vpop.permute.xlu1 %2177 }
0x27f8   :  { %v2761_v1 = vpop.eup %2760 }
0x27f9   :  { %2085 = vrot.lane.b32.xlu0 %v2761_v1, %s2797_s9 }
0x286b   :  { %v2086_v6 = vpop.permute.xlu0 %2085 }
0x286c   :  { %v2088_v29 = vmul.f32 %v2086_v6, %v2083_v4 }
0x286e   :  { %v2093_v7 = vadd.f32 %v2092_v20, %v2088_v29 }
0x2870   :  { %2099 = vrot.lane.b32.xlu0 %v2093_v7, %s2800_s12 }
0x28e2   :  { %v2100_v14 = vpop.permute.xlu0 %2099 }
0x28e3   :  { %2518 = vmatmul.mubr.msk.f32.vlgmr.msra.gmra.mrb[20].mxu1 %vm617_vm12, %v2100_v14 }
0x29b6   :  { %v2172_v9 = vpop.f32.mrb[20].mxu1 }
0x29b7   :  { %v2173_v56 = vadd.f32 %v2172_v9, %v2097_v8  ;;  %v2519_v10 = vpop.f32.mrb[21].mxu1 }
0x29b9   :  { %v2180_v16 = vadd.f32 %v2178_v11, %v2173_v56 }
0x29bb   :  { %v2197_v12 = vsel %vm2196_vm13, %v2180_v16, %v2864_v52 }
0x29bc   :  { %2199 = vst.msk [vmem:[%s3161_s3] sm:$0x3] %vm2198_vm14, %v2197_v12 }
0x29bd   :  { %2204 = vsyncpa [#allocation3], 1 }

</bundles_post_ra>
